<compile_context>
chip_gen: v7x
topology: tpu7x:2x2x1
jax: 0.10.0
libtpu: 0.0.40
codegen_flags: <defaults>
</compile_context>

<pallas_src>
import functools
import math

import numpy as np
import jax
import jax.numpy as jnp
from jax import lax
from jax.experimental import pallas as pl
from jax.experimental.pallas import tpu as pltpu


NEG_INF = -1e30  # large finite negative: avoids exp(-inf - -inf) NaNs


def _tile(size, pref, align):
    """Largest multiple of `align` that divides `size` and is <= pref.

    Falls back to the full extent (always a legal block size) if none exists,
    so we never emit tiles that violate the (8, 128) divisibility rule.
    """
    if size <= pref:
        return size
    t = (min(pref, size) // align) * align
    while t >= align:
        if size % t == 0:
            return t
        t -= align
    return size


# ---------------------------------------------------------------------------
# Tiled matmul kernel (y = x @ w), bf16 inputs, f32 accumulation
# ---------------------------------------------------------------------------

def matmul_kernel(x_ref, w_ref, o_ref, acc_ref):
    @pl.when(pl.program_id(2) == 0)
    def _():
        acc_ref[...] = jnp.zeros_like(acc_ref)

    acc_ref[...] += jnp.dot(
        x_ref[...], w_ref[...], preferred_element_type=jnp.float32
    )

    @pl.when(pl.program_id(2) == pl.num_programs(2) - 1)
    def _():
        o_ref[...] = acc_ref[...].astype(o_ref.dtype)


def pallas_matmul(x, w, *, tm=512, tn=512, tk=512, out_dtype=None):
    """x: (M, K), w: (K, N) -> (M, N); tiled & pipelined over (M, N, K)."""
    M, K = x.shape
    K2, N = w.shape
    assert K == K2
    out_dtype = out_dtype or x.dtype
    tm = _tile(M, tm, 8)
    tn = _tile(N, tn, 128)
    tk = _tile(K, tk, 128)
    grid = (M // tm, N // tn, K // tk)
    return pl.pallas_call(
        matmul_kernel,
        out_shape=jax.ShapeDtypeStruct((M, N), out_dtype),
        grid_spec=pltpu.PrefetchScalarGridSpec(
            num_scalar_prefetch=0,
            grid=grid,
            in_specs=[
                pl.BlockSpec((tm, tk), lambda i, j, k: (i, k)),
                pl.BlockSpec((tk, tn), lambda i, j, k: (k, j)),
            ],
            out_specs=pl.BlockSpec((tm, tn), lambda i, j, k: (i, j)),
            scratch_shapes=[pltpu.VMEM((tm, tn), jnp.float32)],
        ),
        compiler_params=pltpu.CompilerParams(
            dimension_semantics=("parallel", "parallel", "arbitrary"),
            vmem_limit_bytes=48 * 1024 * 1024,
        ),
    )(x, w)


# ---------------------------------------------------------------------------
# Flash-attention kernel (causal) with fused rotate-half RoPE.
#   Inputs: the fused (B, S, 3*dim) qkv tensor (passed three times with
#   head-selecting BlockSpecs) + cos / signed-sin RoPE tables.
# ---------------------------------------------------------------------------

def flash_attn_kernel(q_ref, k_ref, v_ref, cosq_ref, sinq_ref, cosk_ref, sink_ref,
                      o_ref, m_sc, l_sc, acc_sc, qrope_sc, *, scale, tq, tk):
    qi = pl.program_id(2)
    ki = pl.program_id(3)
    D = q_ref.shape[-1]

    @pl.when(ki == 0)
    def _():
        m_sc[...] = jnp.full_like(m_sc, NEG_INF)
        l_sc[...] = jnp.zeros_like(l_sc)
        acc_sc[...] = jnp.zeros_like(acc_sc)
        # RoPE q once per (b, h, qi); rotate-half form (weights pre-permuted).
        q = q_ref[0].astype(jnp.float32)
        q = q * cosq_ref[...] + pltpu.roll(q, D // 2, axis=1) * sinq_ref[...]
        qrope_sc[...] = (q * scale).astype(qrope_sc.dtype)

    q_start = qi * tq
    k_start = ki * tk

    # Skip fully-masked (strictly future) KV tiles: causal => col <= row.
    # The K/V index_maps clamp the block index for these steps, so no DMA either.
    @pl.when(k_start <= q_start + (tq - 1))
    def _():
        k = k_ref[0].astype(jnp.float32)
        k = k * cosk_ref[...] + pltpu.roll(k, D // 2, axis=1) * sink_ref[...]
        k = k.astype(k_ref.dtype)
        v = v_ref[0]
        q = qrope_sc[...]

        # Q . K^T via dot_general (contract on head_dim), f32 accumulation.
        s = lax.dot_general(
            q, k, (((1,), (1,)), ((), ())),
            preferred_element_type=jnp.float32)  # (tq, tk)

        # Causal mask built from iotas; no (S, S) mask array is ever DMA'd.
        row = q_start + lax.broadcasted_iota(jnp.int32, (tq, tk), 0)
        col = k_start + lax.broadcasted_iota(jnp.int32, (tq, tk), 1)
        s = jnp.where(col <= row, s, NEG_INF)

        m_prev = m_sc[...]
        m_new = jnp.maximum(m_prev, s.max(axis=-1, keepdims=True))
        alpha = jnp.exp(m_prev - m_new)
        p = jnp.exp(s - m_new)
        l_sc[...] = alpha * l_sc[...] + p.sum(axis=-1, keepdims=True)
        acc_sc[...] = alpha * acc_sc[...] + jnp.dot(
            p.astype(v.dtype), v, preferred_element_type=jnp.float32)
        m_sc[...] = m_new

    @pl.when(ki == pl.num_programs(3) - 1)
    def _():
        inv_l = pl.reciprocal(l_sc[...], approx=True)
        o_ref[0] = (acc_sc[...] * inv_l).astype(o_ref.dtype)


def pallas_flash_attention(qkv, cos_full, sin_signed, n_heads, head_dim,
                           *, tq=256, tk=256):
    """qkv: (B, S, 3*H*D) fused projection output (q/k heads in half-split RoPE
    layout); cos_full/sin_signed: (S, D) f32 tables. Returns (B, S, H*D)."""
    B, S, three_dim = qkv.shape
    H, D = n_heads, head_dim
    dim = H * D
    assert three_dim == 3 * dim
    tq = _tile(S, tq, 8)
    tk = _tile(S, tk, 128)
    scale = 1.0 / math.sqrt(D)
    grid = (B, H, S // tq, S // tk)

    def kv_block(qi, ki):
        # Clamp to the last KV block that intersects the causal region for this
        # query tile -> fully-masked steps repeat the block index (no re-DMA).
        return jnp.minimum(ki, ((qi + 1) * tq - 1) // tk)

    kernel = functools.partial(flash_attn_kernel, scale=scale, tq=tq, tk=tk)
    return pl.pallas_call(
        kernel,
        out_shape=jax.ShapeDtypeStruct((B, S, dim), qkv.dtype),
        grid_spec=pltpu.PrefetchScalarGridSpec(
            num_scalar_prefetch=0,
            grid=grid,
            in_specs=[
                # q head h
                pl.BlockSpec((1, tq, D), lambda b, h, qi, ki: (b, qi, h)),
                # k head h (offset H), clamped on the KV axis
                pl.BlockSpec((1, tk, D),
                             lambda b, h, qi, ki: (b, kv_block(qi, ki), H + h)),
                # v head h (offset 2H), clamped on the KV axis
                pl.BlockSpec((1, tk, D),
                             lambda b, h, qi, ki: (b, kv_block(qi, ki), 2 * H + h)),
                # RoPE tables for the q tile
                pl.BlockSpec((tq, D), lambda b, h, qi, ki: (qi, 0)),
                pl.BlockSpec((tq, D), lambda b, h, qi, ki: (qi, 0)),
                # RoPE tables for the k tile (clamped like k)
                pl.BlockSpec((tk, D), lambda b, h, qi, ki: (kv_block(qi, ki), 0)),
                pl.BlockSpec((tk, D), lambda b, h, qi, ki: (kv_block(qi, ki), 0)),
            ],
            out_specs=pl.BlockSpec((1, tq, D), lambda b, h, qi, ki: (b, qi, h)),
            scratch_shapes=[
                pltpu.VMEM((tq, 1), jnp.float32),   # running max m
                pltpu.VMEM((tq, 1), jnp.float32),   # running denom l
                pltpu.VMEM((tq, D), jnp.float32),   # unnormalized acc
                pltpu.VMEM((tq, D), qkv.dtype),     # RoPE'd, scaled q cache
            ],
        ),
        compiler_params=pltpu.CompilerParams(
            dimension_semantics=("parallel", "parallel", "parallel", "arbitrary"),
            vmem_limit_bytes=48 * 1024 * 1024,
        ),
    )(qkv, qkv, qkv, cos_full, sin_signed, cos_full, sin_signed)


# ---------------------------------------------------------------------------
# Interleaved (complex) RoPE in plain JAX — used by the pure-JAX reference only.
# ---------------------------------------------------------------------------

def apply_rotary_emb_jax(xq, xk, cos, sin):
    """xq/xk: (B, S, H, D); cos/sin: (S, D//2). Matches torch.view_as_complex
    pairing (even=real, odd=imag)."""
    def rot(x):
        B, S, H, D = x.shape
        xr = x.reshape(B, S, H, D // 2, 2)
        x_re, x_im = xr[..., 0], xr[..., 1]
        c = cos[None, :, None, :]
        s = sin[None, :, None, :]
        o_re = x_re * c - x_im * s
        o_im = x_re * s + x_im * c
        return jnp.stack([o_re, o_im], axis=-1).reshape(B, S, H, D)
    return rot(xq), rot(xk)


# ---------------------------------------------------------------------------
# Attention module (forward only)
# ---------------------------------------------------------------------------

class AttentionPallas:
    def __init__(self, dim, n_heads, key, dtype=jnp.bfloat16):
        self.dim = dim
        self.n_heads = n_heads
        self.head_dim = dim // n_heads
        self.dtype = dtype
        kq, kk, kv, ko = jax.random.split(key, 4)
        std = 1.0 / math.sqrt(dim)

        def init(k, shape):
            return jax.random.uniform(k, shape, jnp.float32, -std, std).astype(dtype)

        # Weights stored PRE-TRANSPOSED ((in, out) layout, y = x @ W_t).
        self.wq_t = init(kq, (dim, dim))
        self.wk_t = init(kk, (dim, dim))
        self.wv_t = init(kv, (dim, dim))
        self.wo_t = init(ko, (dim, dim))

        # Kernel-side fused QKV weight: q/k head columns permuted once,
        # interleaved -> half-split, so in-kernel RoPE is rotate-half (pltpu.roll).
        D, H = self.head_dim, n_heads
        perm = np.concatenate([np.arange(0, D, 2), np.arange(1, D, 2)])
        full_perm = np.concatenate([h * D + perm for h in range(H)])
        self.wqkv_t = jnp.concatenate(
            [self.wq_t[:, full_perm], self.wk_t[:, full_perm], self.wv_t], axis=1)

    def __call__(self, x, cos_half, sin_half):
        B, S, _ = x.shape
        H, D = self.n_heads, self.head_dim
        xb = x.astype(self.dtype)
        x2d = xb.reshape(B * S, self.dim)

        # Fused QKV projection: one tiled matmul, x read from HBM once.
        qkv = pallas_matmul(x2d, self.wqkv_t)              # (B*S, 3*dim) bf16
        qkv = qkv.reshape(B, S, 3 * self.dim)

        # Rotate-half RoPE tables (f32): cos duplicated, sin sign-split.
        cos_full = jnp.concatenate([cos_half, cos_half], axis=-1).astype(jnp.float32)
        sin_signed = jnp.concatenate([-sin_half, sin_half], axis=-1).astype(jnp.float32)

        # Flash attention directly on the fused qkv tensor: head selection and
        # RoPE both happen inside the kernel (no XLA-side slicing / transposes).
        out = pallas_flash_attention(qkv, cos_full, sin_signed, H, D)  # (B,S,dim)

        # Output projection.
        y = pallas_matmul(out.reshape(B * S, self.dim), self.wo_t)
        return y.reshape(B, S, self.dim)


# ---------------------------------------------------------------------------
# Pure-JAX reference (faithful to the PyTorch module's math)
# ---------------------------------------------------------------------------

def reference_forward(attn, x, cos_half, sin_half):
    B, S, _ = x.shape
    H, D = attn.n_heads, attn.head_dim
    dt = attn.dtype
    xb = x.astype(dt)
    x2d = xb.reshape(B * S, attn.dim)

    def proj(w):
        return jnp.dot(x2d, w, preferred_element_type=jnp.float32).astype(dt)

    xq = proj(attn.wq_t).reshape(B, S, H, D)
    xk = proj(attn.wk_t).reshape(B, S, H, D)
    xv = proj(attn.wv_t).reshape(B, S, H, D)

    xq4, xk4 = apply_rotary_emb_jax(
        xq.astype(jnp.float32), xk.astype(jnp.float32), cos_half, sin_half)

    q = jnp.transpose(xq4.astype(dt), (0, 2, 1, 3))        # (B,H,S,D)
    k = jnp.transpose(xk4.astype(dt), (0, 2, 1, 3))
    v = jnp.transpose(xv, (0, 2, 1, 3))

    scores = jnp.einsum("bhqd,bhkd->bhqk", q, k,
                        preferred_element_type=jnp.float32) / math.sqrt(D)
    causal = jnp.tril(jnp.ones((S, S), dtype=bool))
    scores = jnp.where(causal[None, None], scores, NEG_INF)
    p = jax.nn.softmax(scores.astype(jnp.float32), axis=-1)
    out = jnp.einsum("bhqk,bhkd->bhqd", p.astype(dt), v,
                     preferred_element_type=jnp.float32).astype(dt)
    out = jnp.transpose(out, (0, 2, 1, 3)).reshape(B, S, H * D)
    y = jnp.dot(out.reshape(B * S, attn.dim), attn.wo_t,
                preferred_element_type=jnp.float32).astype(dt)
    return y.reshape(B, S, attn.dim)


# ---------------------------------------------------------------------------
# Main
# ---------------------------------------------------------------------------

if __name__ == "__main__":
    # Scaled-down llama2 shapes (head_dim kept at 128 for lane-dense tiles;
    # S=512 so the causal-skip / clamped-DMA / online-softmax paths are exercised).
    B, S, DIM, N_HEADS = 2, 512, 512, 4
    HEAD_DIM = DIM // N_HEADS
    THETA = 10000.0

    key = jax.random.PRNGKey(0)
    kx, kw = jax.random.split(key)

    x = jax.random.normal(kx, (B, S, DIM), dtype=jnp.float32)

    # freqs_cis as (cos, sin), shape (S, HEAD_DIM // 2)
    freqs = 1.0 / (THETA ** (jnp.arange(0, HEAD_DIM, 2, dtype=jnp.float32) / HEAD_DIM))
    t = jnp.arange(S, dtype=jnp.float32)
    angles = jnp.outer(t, freqs)
    cos_half, sin_half = jnp.cos(angles), jnp.sin(angles)

    attn = AttentionPallas(DIM, N_HEADS, kw)

    y = jax.block_until_ready(attn(x, cos_half, sin_half))
    y_ref = jax.block_until_ready(reference_forward(attn, x, cos_half, sin_half))

    np.testing.assert_allclose(
        np.asarray(y, dtype=np.float32),
        np.asarray(y_ref, dtype=np.float32),
        rtol=5e-2, atol=5e-2,
    )

    print("KERNEL_OK")
</pallas_src>

<mosaic_0001>
module attributes {stable_mosaic.version = 11 : i64} {
  func.func @matmul_kernel(%arg0: i32, %arg1: i32, %arg2: i32, %arg3: memref<512x512xbf16, #tpu.memory_space<vmem>>, %arg4: memref<512x512xbf16, #tpu.memory_space<vmem>>, %arg5: memref<512x512xbf16, #tpu.memory_space<vmem>>, %arg6: memref<512x512xf32, #tpu.memory_space<vmem>>) attributes {dimension_semantics = [#tpu.dimension_semantics<parallel>, #tpu.dimension_semantics<parallel>, #tpu.dimension_semantics<arbitrary>], iteration_bounds = array<i64: 2, 3, 1>, scalar_prefetch = 0 : i64, scratch_operands = 1 : i64, tpu.core_type = #tpu.core_type<tc>, window_params = [{transform_indices = @transform_0, window_bounds = array<i64: 512, 512>}, {transform_indices = @transform_1, window_bounds = array<i64: 512, 512>}, {transform_indices = @transform_2, window_bounds = array<i64: 512, 512>}]} {
    %c0_i32 = arith.constant 0 : i32
    %0 = arith.cmpi eq, %arg2, %c0_i32 : i32
    %1 = arith.extui %0 : i1 to i32
    %c0_i32_0 = arith.constant 0 : i32
    %2 = arith.cmpi ne, %1, %c0_i32_0 : i32
    scf.if %2 {
      %cst_10 = arith.constant 0.000000e+00 : f32
      %12 = vector.broadcast %cst_10 : f32 to vector<512x512xf32>
      %c0_11 = arith.constant 0 : index
      %c0_12 = arith.constant 0 : index
      %13 = vector.load %arg6[%c0_11, %c0_12] : memref<512x512xf32, #tpu.memory_space<vmem>>, vector<512x512xf32>
      tpu.vector_store %arg6[%c0_11, %c0_12], %12 {strides = array<i32>} : memref<512x512xf32, #tpu.memory_space<vmem>>, vector<512x512xf32>,
    } else {
    }
    %c0 = arith.constant 0 : index
    %c0_1 = arith.constant 0 : index
    %3 = vector.load %arg6[%c0, %c0_1] : memref<512x512xf32, #tpu.memory_space<vmem>>, vector<512x512xf32>
    %c0_2 = arith.constant 0 : index
    %c0_3 = arith.constant 0 : index
    %4 = vector.load %arg3[%c0_2, %c0_3] : memref<512x512xbf16, #tpu.memory_space<vmem>>, vector<512x512xbf16>
    %c0_4 = arith.constant 0 : index
    %c0_5 = arith.constant 0 : index
    %5 = vector.load %arg4[%c0_4, %c0_5] : memref<512x512xbf16, #tpu.memory_space<vmem>>, vector<512x512xbf16>
    %cst = arith.constant dense<0.000000e+00> : vector<512x512xf32>
    %6 = tpu.matmul %4, %5, %cst {dimension_numbers = #tpu.dot_dimension_numbers<[1], [0], [0], [1], [0, 0, 1, 1], [], []>} : vector<512x512xbf16>, vector<512x512xbf16>, vector<512x512xf32> -> vector<512x512xf32>
    %7 = arith.addf %3, %6 : vector<512x512xf32>
    %c0_6 = arith.constant 0 : index
    %c0_7 = arith.constant 0 : index
    %8 = vector.load %arg6[%c0_6, %c0_7] : memref<512x512xf32, #tpu.memory_space<vmem>>, vector<512x512xf32>
    tpu.vector_store %arg6[%c0_6, %c0_7], %7 {strides = array<i32>} : memref<512x512xf32, #tpu.memory_space<vmem>>, vector<512x512xf32>,
    %c0_i32_8 = arith.constant 0 : i32
    %9 = arith.cmpi eq, %arg2, %c0_i32_8 : i32
    %10 = arith.extui %9 : i1 to i32
    %c0_i32_9 = arith.constant 0 : i32
    %11 = arith.cmpi ne, %10, %c0_i32_9 : i32
    scf.if %11 {
      %c0_10 = arith.constant 0 : index
      %c0_11 = arith.constant 0 : index
      %12 = vector.load %arg6[%c0_10, %c0_11] : memref<512x512xf32, #tpu.memory_space<vmem>>, vector<512x512xf32>
      %13 = arith.truncf %12 : vector<512x512xf32> to vector<512x512xbf16>
      %c0_12 = arith.constant 0 : index
      %c0_13 = arith.constant 0 : index
      %14 = vector.load %arg5[%c0_12, %c0_13] : memref<512x512xbf16, #tpu.memory_space<vmem>>, vector<512x512xbf16>
      tpu.vector_store %arg5[%c0_12, %c0_13], %13 {strides = array<i32>} : memref<512x512xbf16, #tpu.memory_space<vmem>>, vector<512x512xbf16>,
    } else {
    }
    return
  }
  func.func @transform_0(%arg0: i32, %arg1: i32, %arg2: i32) -> (i32, i32) {
    %c0_i32 = arith.constant 0 : i32
    return %arg0, %arg2 : i32, i32
  }
  func.func @transform_1(%arg0: i32, %arg1: i32, %arg2: i32) -> (i32, i32) {
    %c0_i32 = arith.constant 0 : i32
    return %arg2, %arg1 : i32, i32
  }
  func.func @transform_2(%arg0: i32, %arg1: i32, %arg2: i32) -> (i32, i32) {
    %c0_i32 = arith.constant 0 : i32
    return %arg0, %arg1 : i32, i32
  }
}

</mosaic_0001>

<bundles_post_ra>
// kernel: tpu_custom_call.1
= control target key start
LH: loop header
LB: loop body
LE: loop exit
PB: predicated region body
PF: predicated region fallthrough
CT: control target
= control target key end

     0   :  { %s7797_s0 = inlined_call_operand.hbm [shape: bf16[1024,512], index: 0, kind: input, shape index: {}]   ;;  %s7798_s1 = inlined_call_operand.hbm [shape: bf16[512,1536], index: 1, kind: input, shape index: {}]   ;;  %s7799_s2 = inlined_call_operand.hbm [shape: bf16[1024,1536], index: 2, kind: output, shape index: {}]  }
   0x1   :  { %7813 = sst [smem:[#allocation18_spill]] %s7797_s0 }
   0x2   :  { %7814 = sst [smem:[#allocation19_spill]] %s7799_s2 }
   0x3   :  { %7 = vsyncpa [#allocation4], 0 }
   0x4   :  { %9 = vsyncpa [#allocation4 + $0x1], 0 }
   0x5   :  { %10 = vsyncpa [#allocation7], 0 }
   0x6   :  { %12 = vsyncpa [#allocation7 + $0x1], 0 }
   0x7   :  { %13 = vsyncpa [#allocation5], 0 }
   0x8   :  { %15 = vsyncpa [#allocation5 + $0x1], 0  ;;  %s7057_s9 = smov 0   ;;  %s7059_s10 = smov 0  }
   0x9   :  { %s7061_s11 = smov 0   ;;  %s7063_s12 = smov 0  }
   0xa   :  { %s7065_s13 = smov 0   ;;  %s7067_s14 = smov 0  }
   0xb   :  { %s7069_s15 = smov 0   ;;  %s7071_s16 = smov 0  }
   0xc   :  { %s7073_s17 = smov 0   ;;  %s7075_s18 = smov 0  }
   0xd   :  { %s7077_s19 = smov 0   ;;  %s7079_s20 = smov 0  }
   0xe   :  { %s7081_s21 = smov 0   ;;  %s7083_s22 = smov 0  }
   0xf LB: > { %7815 = sst [smem:[#allocation12_spill]] %s7015_s18  ;;  %s5506_s23 = sadd.s32 4294967295, %s7031_s22   ;;  %s7031_s22 = sphi %s7083_s22, %s21_s22   ;;  %s7027_s21 = sphi %s7081_s21, %s7849_s21   ;;  %s7023_s20 = sphi %s7079_s20, %s7860_s20   ;;  %s7019_s19 = sphi %s7077_s19, %s7847_s19   ;;  %s7015_s18 = sphi %s7075_s18, %s7859_s18   ;;  %s7011_s17 = sphi %s7073_s17, %s7858_s17   ;;  %s7007_s16 = sphi %s7071_s16, %s7857_s16   ;;  %s7003_s15 = sphi %s7069_s15, %s7856_s15   ;;  %s6999_s14 = sphi %s7067_s14, %s7855_s14   ;;  %s6995_s13 = sphi %s7065_s13, %s7854_s13   ;;  %s6991_s12 = sphi %s7063_s12, %s7853_s12   ;;  %s6987_s11 = sphi %s7061_s11, %s7852_s11   ;;  %s6983_s10 = sphi %s7059_s10, %s7851_s10   ;;  %s6979_s9 = sphi %s7057_s9, %s7850_s9  }
  0x10   : > { %7816 = sst [smem:[#allocation13_spill]] %s7027_s21  ;;  %s40_s24 = sadd.s32 1, %s7027_s21 }
  0x11   : > { %p56_p0 = scmp.ne.s32.totalorder %s7011_s17, %s7007_s16  ;;  %p7801_p1 = scmp.eq.s32.totalorder %s7031_s22, 0 }
  0x12   : > { %p62_p2 = scmp.ne.s32.totalorder %s7007_s16, %s7003_s15  ;;  %p7132_p3 = scmp.eq.s32.totalorder %s5506_s23, 0 }
  0x13   : > { %p7136_p4 = scmp.eq.s32.totalorder %s5506_s23, 5  ;;  %p58_p5 = por %p7801_p1, %p56_p0 }
  0x14   : > { %p7144_p6 = por %p7132_p3, %p62_p2  ;;  %p7800_p7 = scmp.lt.s32.totalorder %s7031_s22, 6 }
  0x15   : > { %s7818_s27 = scalar_select %p7136_p4, 1, 0 }
  0x16   : > { %s7819_s28 = scalar_select %p7144_p6, 1, 0 }
  0x17   : > { %s142_s29 = sand.u32 1, %s7011_s17   ;;  %s5913_s30 = sshll.u32 %s7027_s21, 14 }
  0x18   : > { %s5510_s3 = sshll.u32 %s142_s29, 10  ;;  %s7820_s0 = sld [smem:[#allocation18_spill]] }
  0x19   : > { %s146_s7 = scalar_lea.vmem [#allocation3], %s5510_s3  ;;  %p7158_p8 = pnand %p7800_p7, %p58_p5 }
  0x1a   : > { %s156_s8 = sshll.u32 %s146_s7, 4  ;;  %s7164_s23 = scalar_lea.sflag [#allocation4], %s142_s29  ;;  %s7162_s8 = int_to_ptr.vmem [resolvable:$true] %s156_s8 }
  0x1b   : > { %p6823_p10 = pneg %p7158_p8 }
  0x1e   : > { %s7154_s6 = scalar_lea.hbm %s7820_s0, %s5913_s30  ;;  %s6826_s5 = scalar_lea.hbm %s7820_s0, 32768 }
  0x1f   : > { %s6821_s4 = scalar_lea.hbm %s7154_s6, 16384  ;;  %p6827_p13 = scmp.lt.u32.totalorder %s7154_s6, %s7820_s0 }
  0x20   : > { %p6822_p9 = scmp.ne.s32.totalorder %s7154_s6, %s6821_s4  ;;  %p6828_p0 = scmp.lt.u32.totalorder %s6826_s5, %s6821_s4 }
  0x21   : > { %p6830_p5 = scmp.lt.u32.totalorder %s6821_s4, %s7154_s6 }
  0x22   : > { %p6824_p11 = pnand %p6823_p10, %p6822_p9  ;;  %p6829_p2 = por %p6828_p0, %p6827_p13 }
  0x24   : > { %p6825_p12 = pneg %p6824_p11  ;;  %p6831_p7 = por %p6830_p5, %p6829_p2 }
  0x26   : > { %p6832_p1 = pnand %p6831_p7, %p6825_p12 }
  0x28   : > { %6835 = shalt.err (!%p6832_p1)
}
  0x29   : > { %s6836_s29 = scalar_lea.vmem %s7162_s8, 16384  ;;  %s7033_s30 = smov [#allocation3]  }
  0x2a   : > { %p6837_p9 = scmp.ne.s32.totalorder %s7162_s8, %s6836_s29  ;;  %s6841_s3 = sshll.u32 %s7033_s30, 4  ;;  %s6842_s3 = int_to_ptr.vmem [resolvable:$false] %s6841_s3 }
  0x2b   : > { %s6843_s25 = scalar_lea.vmem %s6842_s3, 32768  ;;  %p6844_p4 = scmp.lt.s32.totalorder %s7162_s8, %s6842_s3 }
  0x2c   : > { %p6839_p11 = pnand %p6837_p9, %p6823_p10  ;;  %p6845_p13 = scmp.lt.s32.totalorder %s6843_s25, %s6836_s29 }
  0x2e   : > { %p6840_p6 = pneg %p6839_p11  ;;  %p6846_p0 = por %p6845_p13, %p6844_p4 }
  0x30   : > { %p6847_p2 = pnand %p6846_p0, %p6840_p6 }
  0x32   : > { %6850 = shalt.err (!%p6847_p2)
}
  0x33   : > { %s7803_s4 = smov 256   ;;  %s7804_s5 = smov 16  }
  0x34   : > { %6309 = dma.hbm_to_vmem [thread:$0]  (!%p7158_p8), %s7154_s6, 16384, %s7162_s8, %s7164_s23, %s7803_s4, %s7803_s4, %s7804_s5  }
  0x35   : > { %p5517_p1 = scmp.ge.s32.totalorder %s7031_s22, 1  ;;  %p188_p4 = scmp.lt.s32.totalorder %s7031_s22, 7 }
  0x36   : > { %s5507_s29 = sadd.s32 4294967294, %s7031_s22   ;;  %s36_s30 = sadd.s32 1, %s7023_s20 }
  0x37   : > { %p7197_p6 = pnand %p5517_p1, %p188_p4  ;;  %s77_s3 = sadd.s32 1, %s6999_s14 }
  0x38   : > { %p38_p7 = scmp.ge.s32.totalorder %s36_s30, 3  ;;  %p84_p10 = scmp.ne.s32.totalorder %s6999_s14, %s6995_s13 }
  0x39   : > { %p90_p12 = scmp.ne.s32.totalorder %s6995_s13, %s6991_s12  ;;  %s105_s15 = sadd.s32 1, %s6987_s11 }
  0x3a   : > { %s7862_s30 = smov (%p38_p7, %s36_s30), 0  ;;  %s7864_s24 = smov (!%p38_p7, %s40_s24), %s7027_s21 }
  0x3b   : > { %7823 = sst [smem:[#allocation14_spill]] %s7862_s30  ;;  %s73_s6 = ssub.s32 %s7023_s20, %s7862_s30 }
  0x3c   : > { %p7824_p8 = scmp.eq.s32.totalorder %s7031_s22, 0  ;;  %p42_p9 = scmp.ge.s32.totalorder %s7864_s24, 2 }
  0x3d   : > { %p75_p11 = scmp.eq.s32.totalorder %s73_s6, 0  ;;  %p7224_p13 = por %p90_p12, %p7132_p3 }
  0x3e   : > { %p7218_p5 = por %p84_p10, %p7824_p8  ;;  %p115_p0 = scmp.ne.s32.totalorder %s6987_s11, %s6983_s10 }
  0x3f   : > { %s7826_s12 = scalar_select %p7224_p13, 1, 0 }
  0x40   : > { %s7866_s24 = smov (%p42_p9, %s7864_s24), 0  ;;  %p7829_p2 = scmp.ne.s32.totalorder %s7818_s27, 0 }
  0x41   : > { %7827 = sst [smem:[#allocation15_spill]] %s7866_s24  ;;  %s44_s25 = ssub.s32 %s7027_s21, %s7866_s24 }
  0x42   : > { %s7233_s23 = scalar_select %p75_p11, %s6999_s14, %s77_s3  }
  0x43   : > { %p7239_p1 = por %p7829_p2, %p115_p0  ;;  %p47_p4 = scmp.eq.s32.totalorder %s44_s25, 0 }
  0x44   : > { %7828 = sst [smem:[#allocation16_spill]] %s7233_s23  ;;  %s102_s26 = sor.u32 %s73_s6, %s44_s25 }
  0x45   : > { %s7830_s4 = scalar_select %p7239_p1, 1, 0 }
  0x46   : > { %p103_p3 = scmp.eq.s32.totalorder %s102_s26, 0  ;;  %p121_p7 = scmp.ne.s32.totalorder %s6983_s10, %s6979_s9 }
  0x47   : > { %7831 = sst [smem:[#allocation17_spill]] %s7830_s4  ;;  %s7832_s5 = sadd.s32 1, %s7011_s17 }
  0x48   : > { %s7248_s0 = scalar_select %p47_p4, %s7011_s17, %s7832_s5  }
  0x49   : > { %s7251_s30 = scalar_select %p103_p3, %s6987_s11, %s105_s15  }
  0x4a   : > { %p122_p10 = scmp.eq.s32.totalorder %s5507_s29, 5  ;;  %s166_s3 = sand.u32 1, %s6999_s14  }
  0x4b   : > { %s5514_s23 = sshll.u32 %s166_s3, 10  ;;  %s5914_s24 = sshll.u32 %s7023_s20, 8 }
  0x4c   : > { %p7254_p12 = por %p122_p10, %p121_p7  ;;  %s170_s21 = scalar_lea.vmem [#allocation6], %s5514_s23 }
  0x4d   : > { %s180_s2 = sshll.u32 %s170_s21, 4  ;;  %s7262_s6 = scalar_lea.hbm %s7798_s1, %s5914_s24  ;;  %s7264_s2 = int_to_ptr.vmem [resolvable:$true] %s180_s2 }
  0x4e   : > { %s7833_s27 = scalar_select %p7254_p12, 1, 0 }
  0x4f   : > { %p7834_p8 = scmp.lt.s32.totalorder %s7031_s22, 6  ;;  %s7274_s21 = scalar_lea.sflag [#allocation7], %s166_s3 }
  0x50   : > { %s6851_s29 = scalar_lea.hbm %s7262_s6, 16384  ;;  %s6856_s4 = scalar_lea.hbm %s7798_s1, 49152 }
  0x51   : > { %p7270_p9 = pnand %p7834_p8, %p7218_p5  ;;  %p6852_p11 = scmp.ne.s32.totalorder %s7262_s6, %s6851_s29 }
  0x52   : > { %p6857_p5 = scmp.lt.u32.totalorder %s7262_s6, %s7798_s1  ;;  %p6858_p3 = scmp.lt.u32.totalorder %s6856_s4, %s6851_s29 }
  0x53   : > { %p6853_p0 = pneg %p7270_p9  ;;  %p6860_p10 = scmp.lt.u32.totalorder %s6851_s29, %s7262_s6 }
  0x54   : > { %p6859_p7 = por %p6858_p3, %p6857_p5 }
  0x55   : > { %p6854_p2 = pnand %p6853_p0, %p6852_p11 }
  0x56   : > { %p6861_p8 = por %p6860_p10, %p6859_p7 }
  0x57   : > { %p6855_p4 = pneg %p6854_p2 }
  0x59   : > { %p6862_p12 = pnand %p6861_p8, %p6855_p4 }
  0x5b   : > { %6865 = shalt.err (!%p6862_p12)
}
  0x5c   : > { %s6866_s23 = scalar_lea.vmem %s7264_s2, 16384  ;;  %s7036_s25 = smov [#allocation6]  }
  0x5d   : > { %p6867_p11 = scmp.ne.s32.totalorder %s7264_s2, %s6866_s23  ;;  %s6871_s26 = sshll.u32 %s7036_s25, 4  ;;  %s6872_s26 = int_to_ptr.vmem [resolvable:$false] %s6871_s26 }
  0x5e   : > { %s6873_s3 = scalar_lea.vmem %s6872_s26, 32768  ;;  %p6874_p13 = scmp.lt.s32.totalorder %s7264_s2, %s6872_s26 }
  0x5f   : > { %p6869_p2 = pnand %p6867_p11, %p6853_p0  ;;  %p6875_p5 = scmp.lt.s32.totalorder %s6873_s3, %s6866_s23 }
  0x61   : > { %p6870_p1 = pneg %p6869_p2  ;;  %p6876_p3 = por %p6875_p5, %p6874_p13 }
  0x63   : > { %p6877_p7 = pnand %p6876_p3, %p6870_p1 }
  0x65   : > { %6880 = shalt.err (!%p6877_p7)
}
  0x66   : > { %s7037_s29 = smov 768   ;;  %s7836_s18 = smov 16  }
  0x67   : > { %s7837_s24 = smov 256   ;;  %192 = sbr.rel (%p7197_p6) target bundleno = 917 (0x395), region = 28 }
  0x68   : > { %6312 = dma.hbm_to_vmem [thread:$0]  (!%p7270_p9), %s7262_s6, 16384, %s7264_s2, %s7274_s21, %s7037_s29, %s7837_s24, %s7836_s18  }
  0x69   : > { %s194_s4 = sand.u32 (!%p7197_p6), 1, %s7007_s16   ;;  %p7838_p13 = scmp.ne.s32.totalorder (!%p7197_p6), %s7819_s28, 0 }
  0x6a   : > { %s5518_s15 = sshll.u32 (!%p7197_p6), %s194_s4, 10  ;;  %s195_s8 = scalar_lea.sflag (!%p7197_p6), [#allocation4], %s194_s4 }
  0x6b   : > { %s7307_s23 = scalar_lea.vmem (!%p7197_p6), [#allocation3], %s5518_s15 }
  0x6e   : > { %6966 = dma.done.wait (%p7838_p13), %s195_s8, 16384  }
  0x6f   : > { %6968 = vsyncadd (%p7838_p13), %s195_s8, 4294950912  ;;  %s203_s5 = sand.u32 1, %s6995_s13   ;;  %p7839_p6 = scmp.ne.s32.totalorder %s7826_s12, 0 }
  0x70   : > { %s5519_s25 = sshll.u32 %s203_s5, 10  ;;  %s204_s2 = scalar_lea.sflag [#allocation7], %s203_s5 }
  0x71   : > { %s7314_s6 = scalar_lea.vmem [#allocation6], %s5519_s25 }
  0x72   : > { %6970 = dma.done.wait (%p7839_p6), %s204_s2, 16384  }
  0x73   : > { %6972 = vsyncadd (%p7839_p6), %s204_s2, 4294950912  ;;  %v6437_v0 = vld [vmem:[%s7314_s6 + $0x4] ss:$16 sps:$4 sm:$0xff]   ;;  %v6439_v1 = vld [vmem:[%s7314_s6 + $0xc] ss:$16 sps:$4 sm:$0xff]   ;;  %s230_s28 = sand.u32 1, %s6983_s10  }
  0x74   : > { %2291 = vmatprep.subr.bf16.mxu0 %v6437_v0  ;;  %v6441_v2 = vld [vmem:[%s7314_s6] ss:$16 sps:$4 sm:$0xff]   ;;  %v6442_v3 = vld [vmem:[%s7314_s6 + $0x8] ss:$16 sps:$4 sm:$0xff]   ;;  %2997 = vmatprep.subr.bf16.mxu1 %v6439_v1  ;;  %v6443_v4 = vld [vmem:[%s7314_s6 + $0x24] ss:$16 sps:$4 sm:$0xff]  }
  0x75   : > { %2292 = vmatpush1.bf16.msra.mxu0 %v6441_v2  ;;  %2998 = vmatpush1.bf16.msra.mxu1 %v6442_v3  ;;  %v6445_v5 = vld [vmem:[%s7314_s6 + $0x2c] ss:$16 sps:$4 sm:$0xff]   ;;  %v6447_v6 = vld [vmem:[%s7314_s6 + $0x20] ss:$16 sps:$4 sm:$0xff]   ;;  %v6448_v7 = vld [vmem:[%s7314_s6 + $0x28] ss:$16 sps:$4 sm:$0xff]  }
  0x76   : > { %2293 = vmatprep.subr.bf16.mxu0 %v6443_v4  ;;  %2999 = vmatprep.subr.bf16.mxu1 %v6445_v5  ;;  %v6449_v8 = vld [vmem:[%s7314_s6 + $0x44] ss:$16 sps:$4 sm:$0xff]   ;;  %v6451_v9 = vld [vmem:[%s7314_s6 + $0x4c] ss:$16 sps:$4 sm:$0xff]   ;;  %v6453_v10 = vld [vmem:[%s7314_s6 + $0x40] ss:$16 sps:$4 sm:$0xff]  }
  0x77   : > { %v6454_v11 = vld [vmem:[%s7314_s6 + $0x48] ss:$16 sps:$4 sm:$0xff]   ;;  %v6455_v12 = vld [vmem:[%s7314_s6 + $0x64] ss:$16 sps:$4 sm:$0xff]   ;;  %v6457_v13 = vld [vmem:[%s7314_s6 + $0x6c] ss:$16 sps:$4 sm:$0xff]  }
  0x78   : > { %v6459_v14 = vld [vmem:[%s7314_s6 + $0x60] ss:$16 sps:$4 sm:$0xff]   ;;  %v6460_v15 = vld [vmem:[%s7314_s6 + $0x68] ss:$16 sps:$4 sm:$0xff]   ;;  %v6461_v16 = vld [vmem:[%s7314_s6 + $0x84] ss:$16 sps:$4 sm:$0xff]  }
  0x79   : > { %2294 = vmatpush1.bf16.msra.mxu0 %v6447_v6  ;;  %3000 = vmatpush1.bf16.msra.mxu1 %v6448_v7  ;;  %v6463_v17 = vld [vmem:[%s7314_s6 + $0x8c] ss:$16 sps:$4 sm:$0xff]   ;;  %v6465_v18 = vld [vmem:[%s7314_s6 + $0x80] ss:$16 sps:$4 sm:$0xff]   ;;  %v6466_v19 = vld [vmem:[%s7314_s6 + $0x88] ss:$16 sps:$4 sm:$0xff]  }
  0x7a   : > { %2295 = vmatprep.subr.bf16.mxu0 %v6449_v8  ;;  %3001 = vmatprep.subr.bf16.mxu1 %v6451_v9  ;;  %v6467_v20 = vld [vmem:[%s7314_s6 + $0xa4] ss:$16 sps:$4 sm:$0xff]   ;;  %v6469_v21 = vld [vmem:[%s7314_s6 + $0xac] ss:$16 sps:$4 sm:$0xff]   ;;  %v6471_v22 = vld [vmem:[%s7314_s6 + $0xa0] ss:$16 sps:$4 sm:$0xff]  }
  0x7b   : > { %v6472_v23 = vld [vmem:[%s7314_s6 + $0xa8] ss:$16 sps:$4 sm:$0xff]   ;;  %v6473_v24 = vld [vmem:[%s7314_s6 + $0xc4] ss:$16 sps:$4 sm:$0xff]   ;;  %v6475_v25 = vld [vmem:[%s7314_s6 + $0xcc] ss:$16 sps:$4 sm:$0xff]  }
  0x7c   : > { %v6477_v26 = vld [vmem:[%s7314_s6 + $0xc0] ss:$16 sps:$4 sm:$0xff]   ;;  %v6478_v27 = vld [vmem:[%s7314_s6 + $0xc8] ss:$16 sps:$4 sm:$0xff]   ;;  %v6479_v28 = vld [vmem:[%s7314_s6 + $0xe4] ss:$16 sps:$4 sm:$0xff]  }
  0x7d   : > { %2296 = vmatpush1.bf16.msra.mxu0 %v6453_v10  ;;  %3002 = vmatpush1.bf16.msra.mxu1 %v6454_v11  ;;  %v6481_v29 = vld [vmem:[%s7314_s6 + $0xec] ss:$16 sps:$4 sm:$0xff]   ;;  %v6483_v30 = vld [vmem:[%s7314_s6 + $0xe0] ss:$16 sps:$4 sm:$0xff]   ;;  %v6484_v31 = vld [vmem:[%s7314_s6 + $0xe8] ss:$16 sps:$4 sm:$0xff]  }
  0x7e   : > { %2297 = vmatprep.subr.bf16.mxu0 %v6455_v12  ;;  %3003 = vmatprep.subr.bf16.mxu1 %v6457_v13  ;;  %v6485_v32 = vld [vmem:[%s7314_s6 + $0x104] ss:$16 sps:$4 sm:$0xff]   ;;  %v6487_v33 = vld [vmem:[%s7314_s6 + $0x10c] ss:$16 sps:$4 sm:$0xff]   ;;  %v6489_v34 = vld [vmem:[%s7314_s6 + $0x100] ss:$16 sps:$4 sm:$0xff]  }
  0x7f   : > { %v6490_v35 = vld [vmem:[%s7314_s6 + $0x108] ss:$16 sps:$4 sm:$0xff]   ;;  %v6491_v36 = vld [vmem:[%s7314_s6 + $0x124] ss:$16 sps:$4 sm:$0xff]   ;;  %v6493_v37 = vld [vmem:[%s7314_s6 + $0x12c] ss:$16 sps:$4 sm:$0xff]  }
  0x80   : > { %v6495_v38 = vld [vmem:[%s7314_s6 + $0x120] ss:$16 sps:$4 sm:$0xff]   ;;  %v6496_v39 = vld [vmem:[%s7314_s6 + $0x128] ss:$16 sps:$4 sm:$0xff]   ;;  %v6497_v40 = vld [vmem:[%s7314_s6 + $0x144] ss:$16 sps:$4 sm:$0xff]  }
  0x81   : > { %2298 = vmatpush1.bf16.msra.mxu0 %v6459_v14  ;;  %3004 = vmatpush1.bf16.msra.mxu1 %v6460_v15  ;;  %v6499_v41 = vld [vmem:[%s7314_s6 + $0x14c] ss:$16 sps:$4 sm:$0xff]   ;;  %v6501_v42 = vld [vmem:[%s7314_s6 + $0x140] ss:$16 sps:$4 sm:$0xff]   ;;  %v6502_v43 = vld [vmem:[%s7314_s6 + $0x148] ss:$16 sps:$4 sm:$0xff]  }
  0x82   : > { %2299 = vmatprep.subr.bf16.mxu0 %v6461_v16  ;;  %3005 = vmatprep.subr.bf16.mxu1 %v6463_v17  ;;  %v6503_v44 = vld [vmem:[%s7314_s6 + $0x164] ss:$16 sps:$4 sm:$0xff]   ;;  %v6505_v45 = vld [vmem:[%s7314_s6 + $0x16c] ss:$16 sps:$4 sm:$0xff]   ;;  %v6507_v46 = vld [vmem:[%s7314_s6 + $0x160] ss:$16 sps:$4 sm:$0xff]  }
  0x83   : > { %v6508_v47 = vld [vmem:[%s7314_s6 + $0x168] ss:$16 sps:$4 sm:$0xff]   ;;  %v6535_v48 = vld [vmem:[%s7307_s23 + $0x4] ss:$16 sps:$4 sm:$0xff]   ;;  %v6511_v50 = vld [vmem:[%s7314_s6 + $0x18c] ss:$16 sps:$4 sm:$0xff]  }
  0x84   : > { %v6509_v49 = vld [vmem:[%s7314_s6 + $0x184] ss:$16 sps:$4 sm:$0xff]   ;;  %2323 = vmatprep.mubr.bf16.mxu0 %v6535_v48  ;;  %3029 = vmatprep.mubr.bf16.mxu1 %v6535_v48  ;;  %v6513_v51 = vld [vmem:[%s7314_s6 + $0x180] ss:$16 sps:$4 sm:$0xff]   ;;  %v6514_v52 = vld [vmem:[%s7314_s6 + $0x188] ss:$16 sps:$4 sm:$0xff]  }
  0x85   : > { %2300 = vmatpush1.bf16.msra.mxu0 %v6465_v18  ;;  %3006 = vmatpush1.bf16.msra.mxu1 %v6466_v19  ;;  %v6515_v53 = vld [vmem:[%s7314_s6 + $0x1a4] ss:$16 sps:$4 sm:$0xff]   ;;  %v6517_v54 = vld [vmem:[%s7314_s6 + $0x1ac] ss:$16 sps:$4 sm:$0xff]   ;;  %v6519_v55 = vld [vmem:[%s7314_s6 + $0x1a0] ss:$16 sps:$4 sm:$0xff]  }
  0x86   : > { %2301 = vmatprep.subr.bf16.mxu0 %v6467_v20  ;;  %3007 = vmatprep.subr.bf16.mxu1 %v6469_v21  ;;  %v6520_v56 = vld [vmem:[%s7314_s6 + $0x1a8] ss:$16 sps:$4 sm:$0xff]   ;;  %v6521_v57 = vld [vmem:[%s7314_s6 + $0x1c4] ss:$16 sps:$4 sm:$0xff]   ;;  %v6523_v58 = vld [vmem:[%s7314_s6 + $0x1cc] ss:$16 sps:$4 sm:$0xff]  }
  0x87   : > { %v6525_v59 = vld [vmem:[%s7314_s6 + $0x1c0] ss:$16 sps:$4 sm:$0xff]   ;;  %v6526_v60 = vld [vmem:[%s7314_s6 + $0x1c8] ss:$16 sps:$4 sm:$0xff]   ;;  %v6527_v61 = vld [vmem:[%s7314_s6 + $0x1e4] ss:$16 sps:$4 sm:$0xff]  }
  0x88   : > { %v6529_v62 = vld [vmem:[%s7314_s6 + $0x1ec] ss:$16 sps:$4 sm:$0xff]   ;;  %v6531_v63 = vld [vmem:[%s7314_s6 + $0x1e0] ss:$16 sps:$4 sm:$0xff]   ;;  %v6532_v0 = vld [vmem:[%s7314_s6 + $0x1e8] ss:$16 sps:$4 sm:$0xff]  }
  0x89   : > { %2302 = vmatpush1.bf16.msra.mxu0 %v6471_v22  ;;  %3008 = vmatpush1.bf16.msra.mxu1 %v6472_v23  ;;  %v6538_v1 = vld [vmem:[%s7314_s6 + $0x204] ss:$16 sps:$4 sm:$0xff]   ;;  %v6541_v2 = vld [vmem:[%s7314_s6 + $0x20c] ss:$16 sps:$4 sm:$0xff]   ;;  %v6533_v3 = vld [vmem:[%s7307_s23] ss:$16 sps:$4 sm:$0xff]  }
  0x8a   : > { %2303 = vmatprep.subr.bf16.mxu0 %v6473_v24  ;;  %3009 = vmatprep.subr.bf16.mxu1 %v6475_v25  ;;  %v6536_v4 = vld [vmem:[%s7314_s6 + $0x200] ss:$16 sps:$4 sm:$0xff]   ;;  %v6539_v5 = vld [vmem:[%s7314_s6 + $0x208] ss:$16 sps:$4 sm:$0xff]   ;;  %v6542_v6 = vld [vmem:[%s7307_s23 + $0x24] ss:$16 sps:$4 sm:$0xff]  }
  0x8b   : > { %v6550_v7 = vld [vmem:[%s7314_s6 + $0x224] ss:$16 sps:$4 sm:$0xff]   ;;  %v6553_v8 = vld [vmem:[%s7314_s6 + $0x22c] ss:$16 sps:$4 sm:$0xff]   ;;  %v6548_v9 = vld [vmem:[%s7314_s6 + $0x220] ss:$16 sps:$4 sm:$0xff]  }
  0x8c   : > { %v6551_v10 = vld [vmem:[%s7314_s6 + $0x228] ss:$16 sps:$4 sm:$0xff]   ;;  %v6562_v11 = vld [vmem:[%s7314_s6 + $0x244] ss:$16 sps:$4 sm:$0xff]   ;;  %v6565_v12 = vld [vmem:[%s7314_s6 + $0x24c] ss:$16 sps:$4 sm:$0xff]  }
  0x8d   : > { %2304 = vmatpush1.bf16.msra.mxu0 %v6477_v26  ;;  %3010 = vmatpush1.bf16.msra.mxu1 %v6478_v27  ;;  %v6544_v13 = vld [vmem:[%s7307_s23 + $0x20] ss:$16 sps:$4 sm:$0xff]   ;;  %v6545_v14 = vld [vmem:[%s7307_s23 + $0x44] ss:$16 sps:$4 sm:$0xff]   ;;  %v6563_v16 = vld [vmem:[%s7314_s6 + $0x248] ss:$16 sps:$4 sm:$0xff]  }
  0x8e   : > { %2305 = vmatprep.subr.bf16.mxu0 %v6479_v28  ;;  %3011 = vmatprep.subr.bf16.mxu1 %v6481_v29  ;;  %v6560_v15 = vld [vmem:[%s7314_s6 + $0x240] ss:$16 sps:$4 sm:$0xff]   ;;  %v6574_v17 = vld [vmem:[%s7314_s6 + $0x264] ss:$16 sps:$4 sm:$0xff]   ;;  %v6577_v18 = vld [vmem:[%s7314_s6 + $0x26c] ss:$16 sps:$4 sm:$0xff]  }
  0x8f   : > { %v6572_v19 = vld [vmem:[%s7314_s6 + $0x260] ss:$16 sps:$4 sm:$0xff]   ;;  %v6575_v20 = vld [vmem:[%s7314_s6 + $0x268] ss:$16 sps:$4 sm:$0xff]   ;;  %v6586_v21 = vld [vmem:[%s7314_s6 + $0x284] ss:$16 sps:$4 sm:$0xff]  }
  0x90   : > { %v6589_v22 = vld [vmem:[%s7314_s6 + $0x28c] ss:$16 sps:$4 sm:$0xff]   ;;  %v6547_v23 = vld [vmem:[%s7307_s23 + $0x40] ss:$16 sps:$4 sm:$0xff]   ;;  %v6554_v24 = vld [vmem:[%s7307_s23 + $0x64] ss:$16 sps:$4 sm:$0xff]  }
  0x91   : > { %2306 = vmatpush1.bf16.msra.mxu0 %v6483_v30  ;;  %3012 = vmatpush1.bf16.msra.mxu1 %v6484_v31  ;;  %v6584_v25 = vld [vmem:[%s7314_s6 + $0x280] ss:$16 sps:$4 sm:$0xff]   ;;  %v6587_v26 = vld [vmem:[%s7314_s6 + $0x288] ss:$16 sps:$4 sm:$0xff]   ;;  %v6598_v27 = vld [vmem:[%s7314_s6 + $0x2a4] ss:$16 sps:$4 sm:$0xff]  }
  0x92   : > { %2307 = vmatprep.subr.bf16.mxu0 %v6485_v32  ;;  %3013 = vmatprep.subr.bf16.mxu1 %v6487_v33  ;;  %v6601_v28 = vld [vmem:[%s7314_s6 + $0x2ac] ss:$16 sps:$4 sm:$0xff]   ;;  %v6596_v29 = vld [vmem:[%s7314_s6 + $0x2a0] ss:$16 sps:$4 sm:$0xff]   ;;  %v6599_v30 = vld [vmem:[%s7314_s6 + $0x2a8] ss:$16 sps:$4 sm:$0xff]  }
  0x93   : > { %v6610_v31 = vld [vmem:[%s7314_s6 + $0x2c4] ss:$16 sps:$4 sm:$0xff]   ;;  %v6613_v32 = vld [vmem:[%s7314_s6 + $0x2cc] ss:$16 sps:$4 sm:$0xff]   ;;  %v6556_v33 = vld [vmem:[%s7307_s23 + $0x60] ss:$16 sps:$4 sm:$0xff]  }
  0x94   : > { %v6649_v48 = vld [vmem:[%s7314_s6 + $0x32c] ss:$16 sps:$4 sm:$0xff]   ;;  %s5520_s7 = sshll.u32 %s230_s28, 10  ;;  %s7840_s21 = sld [smem:[#allocation12_spill]] }
  0x95   : > { %2308 = vmatpush1.bf16.msra.mxu0 %v6489_v34  ;;  %3014 = vmatpush1.bf16.msra.mxu1 %v6490_v35  ;;  %v6557_v34 = vld [vmem:[%s7307_s23 + $0x84] ss:$16 sps:$4 sm:$0xff]   ;;  %v6608_v35 = vld [vmem:[%s7314_s6 + $0x2c0] ss:$16 sps:$4 sm:$0xff]   ;;  %s7572_s12 = scalar_lea.vmem [#allocation8], %s5520_s7  ;;  %s6299_s26 = smul.u32 768, %s7019_s19 }
  0x96   : > { %2309 = vmatprep.subr.bf16.mxu0 %v6491_v36  ;;  %3015 = vmatprep.subr.bf16.mxu1 %v6493_v37  ;;  %v6611_v36 = vld [vmem:[%s7314_s6 + $0x2c8] ss:$16 sps:$4 sm:$0xff]   ;;  %v6622_v37 = vld [vmem:[%s7314_s6 + $0x2e4] ss:$16 sps:$4 sm:$0xff]   ;;  %s5387_s18 = sshll.u32 %s7572_s12, 4  ;;  %s7841_s24 = sld [smem:[#allocation17_spill]]  ;;  %s7713_s18 = int_to_ptr.vmem [resolvable:$true] %s5387_s18 }
  0x97   : > { %s7842_s8 = sld [smem:[#allocation19_spill]]  ;;  %s7721_s5 = scalar_lea.sflag [#allocation5], %s230_s28 }
  0x98   : > { %s6881_s25 = scalar_lea.vmem %s7713_s18, 16384  ;;  %s7038_s2 = smov [#allocation8]  }
  0x99   : > { %2310 = vmatpush1.bf16.msra.mxu0 %v6495_v38  ;;  %3016 = vmatpush1.bf16.msra.mxu1 %v6496_v39  ;;  %v6625_v38 = vld [vmem:[%s7314_s6 + $0x2ec] ss:$16 sps:$4 sm:$0xff]   ;;  %v6620_v39 = vld [vmem:[%s7314_s6 + $0x2e0] ss:$16 sps:$4 sm:$0xff]   ;;  %p6882_p1 = scmp.ne.s32.totalorder %s7713_s18, %s6881_s25 }
  0x9a   : > { %2311 = vmatprep.subr.bf16.mxu0 %v6497_v40  ;;  %3017 = vmatprep.subr.bf16.mxu1 %v6499_v41  ;;  %v6559_v40 = vld [vmem:[%s7307_s23 + $0x80] ss:$16 sps:$4 sm:$0xff]   ;;  %v6623_v41 = vld [vmem:[%s7314_s6 + $0x2e8] ss:$16 sps:$4 sm:$0xff]   ;;  %s5907_s3 = sshll.u32 %s7840_s21, 2 }
  0x9b   : > { %s5384_s29 = sadd.s32 %s6299_s26, %s5907_s3 }
  0x9c   : > { %s5909_s19 = sshll.u32 %s5384_s29, 6  ;;  %p7843_p12 = scmp.ne.s32.totalorder %s7841_s24, 0 }
  0x9d   : > { %2312 = vmatpush1.bf16.msra.mxu0 %v6501_v42  ;;  %3018 = vmatpush1.bf16.msra.mxu1 %v6502_v43  ;;  %v6566_v42 = vld [vmem:[%s7307_s23 + $0xa4] ss:$16 sps:$4 sm:$0xff]  }
  0x9e   : > { %2313 = vmatprep.subr.bf16.mxu0 %v6503_v44  ;;  %3019 = vmatprep.subr.bf16.mxu1 %v6505_v45  ;;  %v6634_v43 = vld [vmem:[%s7314_s6 + $0x304] ss:$16 sps:$4 sm:$0xff]   ;;  %v6637_v44 = vld [vmem:[%s7314_s6 + $0x30c] ss:$16 sps:$4 sm:$0xff]   ;;  %v6632_v45 = vld [vmem:[%s7314_s6 + $0x300] ss:$16 sps:$4 sm:$0xff]   ;;  %p6883_p9 = pnand %p6882_p1, %p7843_p12 }
  0xa0   : > { %p6884_p0 = pneg %p6883_p9 }
  0xa1   : > { %2314 = vmatpush1.bf16.msra.mxu0 %v6507_v46  ;;  %3020 = vmatpush1.bf16.msra.mxu1 %v6508_v47  ;;  %v6635_v46 = vld [vmem:[%s7314_s6 + $0x308] ss:$16 sps:$4 sm:$0xff]   ;;  %v6646_v47 = vld [vmem:[%s7314_s6 + $0x324] ss:$16 sps:$4 sm:$0xff]  }
  0xa2   : > { %2315 = vmatprep.subr.bf16.mxu0 %v6509_v49  ;;  %3021 = vmatprep.subr.bf16.mxu1 %v6511_v50  ;;  %v6644_v49 = vld [vmem:[%s7314_s6 + $0x320] ss:$16 sps:$4 sm:$0xff]   ;;  %v6647_v50 = vld [vmem:[%s7314_s6 + $0x328] ss:$16 sps:$4 sm:$0xff]  }
  0xa5   : > { %2316 = vmatpush1.bf16.msra.mxu0 %v6513_v51  ;;  %3022 = vmatpush1.bf16.msra.mxu1 %v6514_v52  ;;  %v6658_v51 = vld [vmem:[%s7314_s6 + $0x344] ss:$16 sps:$4 sm:$0xff]   ;;  %v6568_v52 = vld [vmem:[%s7307_s23 + $0xa0] ss:$16 sps:$4 sm:$0xff]  }
  0xa6   : > { %2317 = vmatprep.subr.bf16.mxu0 %v6515_v53  ;;  %3023 = vmatprep.subr.bf16.mxu1 %v6517_v54  ;;  %v6661_v53 = vld [vmem:[%s7314_s6 + $0x34c] ss:$16 sps:$4 sm:$0xff]   ;;  %v6569_v54 = vld [vmem:[%s7307_s23 + $0xc4] ss:$16 sps:$4 sm:$0xff]  }
  0xa9   : > { %2318 = vmatpush1.bf16.msra.mxu0 %v6519_v55  ;;  %3024 = vmatpush1.bf16.msra.mxu1 %v6520_v56  ;;  %v6656_v55 = vld [vmem:[%s7314_s6 + $0x340] ss:$16 sps:$4 sm:$0xff]   ;;  %v6659_v56 = vld [vmem:[%s7314_s6 + $0x348] ss:$16 sps:$4 sm:$0xff]  }
  0xaa   : > { %2319 = vmatprep.subr.bf16.mxu0 %v6521_v57  ;;  %3025 = vmatprep.subr.bf16.mxu1 %v6523_v58  ;;  %v6571_v57 = vld [vmem:[%s7307_s23 + $0xc0] ss:$16 sps:$4 sm:$0xff]   ;;  %v6578_v58 = vld [vmem:[%s7307_s23 + $0xe4] ss:$16 sps:$4 sm:$0xff]  }
  0xad   : > { %2320 = vmatpush1.bf16.msra.mxu0 %v6525_v59  ;;  %3026 = vmatpush1.bf16.msra.mxu1 %v6526_v60  ;;  %v6668_v59 = vld [vmem:[%s7314_s6 + $0x360] ss:$16 sps:$4 sm:$0xff]   ;;  %v6670_v60 = vld [vmem:[%s7314_s6 + $0x364] ss:$16 sps:$4 sm:$0xff]  }
  0xae   : > { %2321 = vmatprep.subr.bf16.mxu0 %v6527_v61  ;;  %3027 = vmatprep.subr.bf16.mxu1 %v6529_v62  ;;  %v6671_v61 = vld [vmem:[%s7314_s6 + $0x368] ss:$16 sps:$4 sm:$0xff]   ;;  %v6673_v62 = vld [vmem:[%s7314_s6 + $0x36c] ss:$16 sps:$4 sm:$0xff]  }
  0xb1   : > { %2322 = vmatpush1.bf16.msra.mxu0 %v6531_v63  ;;  %3028 = vmatpush1.bf16.msra.mxu1 %v6532_v0  ;;  %v6580_v63 = vld [vmem:[%s7307_s23 + $0xe0] ss:$16 sps:$4 sm:$0xff]   ;;  %v6581_v0 = vld [vmem:[%s7307_s23 + $0x104] ss:$16 sps:$4 sm:$0xff]  }
  0xb2   : > { %2644 = vmatprep.subr.bf16.mxu0 %v6538_v1  ;;  %3350 = vmatprep.subr.bf16.mxu1 %v6541_v2  ;;  %v6583_v1 = vld [vmem:[%s7307_s23 + $0x100] ss:$16 sps:$4 sm:$0xff]   ;;  %v6590_v2 = vld [vmem:[%s7307_s23 + $0x124] ss:$16 sps:$4 sm:$0xff]  }
  0xb4   : > { %2324 = vmatmul.mubr.bf16.vlgmr.msra.gmra.mrb[0].mxu0 %v6533_v3  ;;  %3030 = vmatmul.mubr.bf16.vlgmr.msra.gmra.mrb[0].mxu1 %v6533_v3  ;;  %v6680_v3 = vld [vmem:[%s7314_s6 + $0x380] ss:$16 sps:$4 sm:$0xff]  }
  0xb5   : > { %2645 = vmatpush1.bf16.msra.mxu0 %v6536_v4  ;;  %3351 = vmatpush1.bf16.msra.mxu1 %v6539_v5  ;;  %v6682_v4 = vld [vmem:[%s7314_s6 + $0x384] ss:$16 sps:$4 sm:$0xff]   ;;  %v6683_v5 = vld [vmem:[%s7314_s6 + $0x388] ss:$16 sps:$4 sm:$0xff]  }
  0xb6   : > { %2333 = vmatprep.mubr.bf16.mxu0 %v6542_v6  ;;  %3039 = vmatprep.mubr.bf16.mxu1 %v6542_v6  ;;  %v6685_v6 = vld [vmem:[%s7314_s6 + $0x38c] ss:$16 sps:$4 sm:$0xff]  }
  0xb7   : > { %2646 = vmatprep.subr.bf16.mxu0 %v6550_v7  ;;  %3352 = vmatprep.subr.bf16.mxu1 %v6553_v8  ;;  %v6592_v7 = vld [vmem:[%s7307_s23 + $0x120] ss:$16 sps:$4 sm:$0xff]   ;;  %v6593_v8 = vld [vmem:[%s7307_s23 + $0x144] ss:$16 sps:$4 sm:$0xff]  }
  0xb9   : > { %2647 = vmatpush1.bf16.msra.mxu0 %v6548_v9  ;;  %3353 = vmatpush1.bf16.msra.mxu1 %v6551_v10  ;;  %v6595_v9 = vld [vmem:[%s7307_s23 + $0x140] ss:$16 sps:$4 sm:$0xff]   ;;  %v6602_v10 = vld [vmem:[%s7307_s23 + $0x164] ss:$16 sps:$4 sm:$0xff]  }
  0xba   : > { %2648 = vmatprep.subr.bf16.mxu0 %v6562_v11  ;;  %3354 = vmatprep.subr.bf16.mxu1 %v6565_v12  ;;  %v6692_v11 = vld [vmem:[%s7314_s6 + $0x3a0] ss:$16 sps:$4 sm:$0xff]   ;;  %v6694_v12 = vld [vmem:[%s7314_s6 + $0x3a4] ss:$16 sps:$4 sm:$0xff]  }
  0xbc   : > { %2334 = vmatmul.mubr.bf16.gmra.mrb[4].mxu0 %v6544_v13  ;;  %3040 = vmatmul.mubr.bf16.gmra.mrb[4].mxu1 %v6544_v13  ;;  %v6695_v13 = vld [vmem:[%s7314_s6 + $0x3a8] ss:$16 sps:$4 sm:$0xff]  }
  0xbd   : > { %2343 = vmatprep.mubr.bf16.mxu0 %v6545_v14  ;;  %3049 = vmatprep.mubr.bf16.mxu1 %v6545_v14  ;;  %v6697_v14 = vld [vmem:[%s7314_s6 + $0x3ac] ss:$16 sps:$4 sm:$0xff]  }
  0xbe   : > { %2649 = vmatpush1.bf16.msra.mxu0 %v6560_v15  ;;  %3355 = vmatpush1.bf16.msra.mxu1 %v6563_v16  ;;  %v6604_v15 = vld [vmem:[%s7307_s23 + $0x160] ss:$16 sps:$4 sm:$0xff]   ;;  %v6605_v16 = vld [vmem:[%s7307_s23 + $0x184] ss:$16 sps:$4 sm:$0xff]  }
  0xbf   : > { %2650 = vmatprep.subr.bf16.mxu0 %v6574_v17  ;;  %3356 = vmatprep.subr.bf16.mxu1 %v6577_v18  ;;  %v6607_v17 = vld [vmem:[%s7307_s23 + $0x180] ss:$16 sps:$4 sm:$0xff]   ;;  %v6614_v18 = vld [vmem:[%s7307_s23 + $0x1a4] ss:$16 sps:$4 sm:$0xff]  }
  0xc2   : > { %2651 = vmatpush1.bf16.msra.mxu0 %v6572_v19  ;;  %3357 = vmatpush1.bf16.msra.mxu1 %v6575_v20  ;;  %v6704_v19 = vld [vmem:[%s7314_s6 + $0x3c0] ss:$16 sps:$4 sm:$0xff]   ;;  %v6706_v20 = vld [vmem:[%s7314_s6 + $0x3c4] ss:$16 sps:$4 sm:$0xff]  }
  0xc3   : > { %2652 = vmatprep.subr.bf16.mxu0 %v6586_v21  ;;  %3358 = vmatprep.subr.bf16.mxu1 %v6589_v22  ;;  %v6707_v21 = vld [vmem:[%s7314_s6 + $0x3c8] ss:$16 sps:$4 sm:$0xff]   ;;  %v6709_v22 = vld [vmem:[%s7314_s6 + $0x3cc] ss:$16 sps:$4 sm:$0xff]  }
  0xc4   : > { %2344 = vmatmul.mubr.bf16.gmra.mrb[8].mxu0 %v6547_v23  ;;  %3050 = vmatmul.mubr.bf16.gmra.mrb[8].mxu1 %v6547_v23  ;;  %v6616_v23 = vld [vmem:[%s7307_s23 + $0x1a0] ss:$16 sps:$4 sm:$0xff]  }
  0xc5   : > { %2353 = vmatprep.mubr.bf16.mxu0 %v6554_v24  ;;  %3059 = vmatprep.mubr.bf16.mxu1 %v6554_v24  ;;  %v6617_v24 = vld [vmem:[%s7307_s23 + $0x1c4] ss:$16 sps:$4 sm:$0xff]  }
  0xc6   : > { %2653 = vmatpush1.bf16.msra.mxu0 %v6584_v25  ;;  %3359 = vmatpush1.bf16.msra.mxu1 %v6587_v26  ;;  %v6619_v25 = vld [vmem:[%s7307_s23 + $0x1c0] ss:$16 sps:$4 sm:$0xff]   ;;  %v6626_v26 = vld [vmem:[%s7307_s23 + $0x1e4] ss:$16 sps:$4 sm:$0xff]  }
  0xc7   : > { %2654 = vmatprep.subr.bf16.mxu0 %v6598_v27  ;;  %3360 = vmatprep.subr.bf16.mxu1 %v6601_v28  ;;  %v6716_v27 = vld [vmem:[%s7314_s6 + $0x3e0] ss:$16 sps:$4 sm:$0xff]   ;;  %v6718_v28 = vld [vmem:[%s7314_s6 + $0x3e4] ss:$16 sps:$4 sm:$0xff]  }
  0xca   : > { %2655 = vmatpush1.bf16.msra.mxu0 %v6596_v29  ;;  %3361 = vmatpush1.bf16.msra.mxu1 %v6599_v30  ;;  %v6719_v29 = vld [vmem:[%s7314_s6 + $0x3e8] ss:$16 sps:$4 sm:$0xff]   ;;  %v6721_v30 = vld [vmem:[%s7314_s6 + $0x3ec] ss:$16 sps:$4 sm:$0xff]   ;;  %s6885_s6 = sshll.u32 %s7038_s2, 4  ;;  %s6886_s6 = int_to_ptr.vmem [resolvable:$false] %s6885_s6 }
  0xcb   : > { %2656 = vmatprep.subr.bf16.mxu0 %v6610_v31  ;;  %3362 = vmatprep.subr.bf16.mxu1 %v6613_v32  ;;  %v6628_v31 = vld [vmem:[%s7307_s23 + $0x1e0] ss:$16 sps:$4 sm:$0xff]   ;;  %v6629_v32 = vld [vmem:[%s7307_s23 + $0x204] ss:$16 sps:$4 sm:$0xff]   ;;  %s6887_s7 = scalar_lea.vmem %s6886_s6, 32768  ;;  %p6888_p4 = scmp.lt.s32.totalorder %s7713_s18, %s6886_s6 }
  0xcc   : > { %2354 = vmatmul.mubr.bf16.gmra.mrb[12].mxu0 %v6556_v33  ;;  %3060 = vmatmul.mubr.bf16.gmra.mrb[12].mxu1 %v6556_v33  ;;  %v6631_v33 = vld [vmem:[%s7307_s23 + $0x200] ss:$16 sps:$4 sm:$0xff]   ;;  %p6889_p10 = scmp.lt.s32.totalorder %s6887_s7, %s6881_s25 }
  0xcd   : > { %2363 = vmatprep.mubr.bf16.mxu0 %v6557_v34  ;;  %3069 = vmatprep.mubr.bf16.mxu1 %v6557_v34  ;;  %v6638_v34 = vld [vmem:[%s7307_s23 + $0x224] ss:$16 sps:$4 sm:$0xff]  }
  0xce   : > { %2657 = vmatpush1.bf16.msra.mxu0 %v6608_v35  ;;  %3363 = vmatpush1.bf16.msra.mxu1 %v6611_v36  ;;  %v6640_v35 = vld [vmem:[%s7307_s23 + $0x220] ss:$16 sps:$4 sm:$0xff]   ;;  %v6641_v36 = vld [vmem:[%s7307_s23 + $0x244] ss:$16 sps:$4 sm:$0xff]   ;;  %p6890_p8 = por %p6889_p10, %p6888_p4 }
  0xcf   : > { %2658 = vmatprep.subr.bf16.mxu0 %v6622_v37  ;;  %3364 = vmatprep.subr.bf16.mxu1 %v6625_v38  ;;  %v6643_v37 = vld [vmem:[%s7307_s23 + $0x240] ss:$16 sps:$4 sm:$0xff]   ;;  %v6650_v38 = vld [vmem:[%s7307_s23 + $0x264] ss:$16 sps:$4 sm:$0xff]  }
  0xd0   : > { %p6891_p11 = pnand %p6890_p8, %p6884_p0 }
  0xd2   : > { %2659 = vmatpush1.bf16.msra.mxu0 %v6620_v39  ;;  %3365 = vmatpush1.bf16.msra.mxu1 %v6623_v41  ;;  %v6652_v39 = vld [vmem:[%s7307_s23 + $0x260] ss:$16 sps:$4 sm:$0xff]  }
  0xd3   : > { %2660 = vmatprep.subr.bf16.mxu0 %v6634_v43  ;;  %3366 = vmatprep.subr.bf16.mxu1 %v6637_v44  ;;  %v6655_v41 = vld [vmem:[%s7307_s23 + $0x280] ss:$16 sps:$4 sm:$0xff]   ;;  %v6665_v44 = vld [vmem:[%s7307_s23 + $0x2c4] ss:$16 sps:$4 sm:$0xff]  }
  0xd4   : > { %2364 = vmatmul.mubr.bf16.gmra.mrb[16].mxu0 %v6559_v40  ;;  %3070 = vmatmul.mubr.bf16.gmra.mrb[16].mxu1 %v6559_v40  ;;  %v6653_v40 = vld [vmem:[%s7307_s23 + $0x284] ss:$16 sps:$4 sm:$0xff]   ;;  %v6664_v43 = vld [vmem:[%s7307_s23 + $0x2a0] ss:$16 sps:$4 sm:$0xff]  }
  0xd5   : > { %2373 = vmatprep.mubr.bf16.mxu0 %v6566_v42  ;;  %3079 = vmatprep.mubr.bf16.mxu1 %v6566_v42  ;;  %v6662_v42 = vld [vmem:[%s7307_s23 + $0x2a4] ss:$16 sps:$4 sm:$0xff]  }
  0xd6   : > { %2661 = vmatpush1.bf16.msra.mxu0 %v6632_v45  ;;  %3367 = vmatpush1.bf16.msra.mxu1 %v6635_v46  ;;  %v6667_v45 = vld [vmem:[%s7307_s23 + $0x2c0] ss:$16 sps:$4 sm:$0xff]   ;;  %v6674_v46 = vld [vmem:[%s7307_s23 + $0x2e4] ss:$16 sps:$4 sm:$0xff]  }
  0xd7   : > { %2662 = vmatprep.subr.bf16.mxu0 %v6646_v47  ;;  %3368 = vmatprep.subr.bf16.mxu1 %v6649_v48  ;;  %v6676_v47 = vld [vmem:[%s7307_s23 + $0x2e0] ss:$16 sps:$4 sm:$0xff]   ;;  %v6677_v48 = vld [vmem:[%s7307_s23 + $0x304] ss:$16 sps:$4 sm:$0xff]  }
  0xda   : > { %2663 = vmatpush1.bf16.msra.mxu0 %v6644_v49  ;;  %3369 = vmatpush1.bf16.msra.mxu1 %v6647_v50  ;;  %v6679_v49 = vld [vmem:[%s7307_s23 + $0x300] ss:$16 sps:$4 sm:$0xff]   ;;  %v6686_v50 = vld [vmem:[%s7307_s23 + $0x324] ss:$16 sps:$4 sm:$0xff]  }
  0xdb   : > { %2664 = vmatprep.subr.bf16.mxu0 %v6658_v51  ;;  %3370 = vmatprep.subr.bf16.mxu1 %v6661_v53  ;;  %v6688_v51 = vld [vmem:[%s7307_s23 + $0x320] ss:$16 sps:$4 sm:$0xff]  }
  0xdc   : > { %2374 = vmatmul.mubr.bf16.gmra.mrb[20].mxu0 %v6568_v52  ;;  %3080 = vmatmul.mubr.bf16.gmra.mrb[20].mxu1 %v6568_v52  ;;  %v6689_v52 = vld [vmem:[%s7307_s23 + $0x344] ss:$16 sps:$4 sm:$0xff]   ;;  %v6691_v53 = vld [vmem:[%s7307_s23 + $0x340] ss:$16 sps:$4 sm:$0xff]  }
  0xdd   : > { %2383 = vmatprep.mubr.bf16.mxu0 %v6569_v54  ;;  %3089 = vmatprep.mubr.bf16.mxu1 %v6569_v54  ;;  %v6698_v54 = vld [vmem:[%s7307_s23 + $0x364] ss:$16 sps:$4 sm:$0xff]  }
  0xde   : > { %2665 = vmatpush1.bf16.msra.mxu0 %v6656_v55  ;;  %3371 = vmatpush1.bf16.msra.mxu1 %v6659_v56  ;;  %v6700_v55 = vld [vmem:[%s7307_s23 + $0x360] ss:$16 sps:$4 sm:$0xff]   ;;  %v6701_v56 = vld [vmem:[%s7307_s23 + $0x384] ss:$16 sps:$4 sm:$0xff]  }
  0xdf   : > { %2666 = vmatprep.subr.bf16.mxu0 %v6670_v60  ;;  %3372 = vmatprep.subr.bf16.mxu1 %v6673_v62  ;;  %v6713_v60 = vld [vmem:[%s7307_s23 + $0x3c4] ss:$16 sps:$4 sm:$0xff]  }
  0xe0   : > { %v6722_v62 = vld [vmem:[%s7307_s23 + $0x3e4] ss:$16 sps:$4 sm:$0xff]  }
  0xe2   : > { %2667 = vmatpush1.bf16.msra.mxu0 %v6668_v59  ;;  %3373 = vmatpush1.bf16.msra.mxu1 %v6671_v61  ;;  %v6712_v59 = vld [vmem:[%s7307_s23 + $0x3a0] ss:$16 sps:$4 sm:$0xff]  }
  0xe3   : > { %2668 = vmatprep.subr.bf16.mxu0 %v6682_v4  ;;  %3374 = vmatprep.subr.bf16.mxu1 %v6685_v6  ;;  %v6715_v61 = vld [vmem:[%s7307_s23 + $0x3c0] ss:$16 sps:$4 sm:$0xff]   ;;  %v6731_v4 = vld [vmem:[%s7307_s23 + $0x4c] ss:$16 sps:$4 sm:$0xff]  }
  0xe4   : > { %2384 = vmatmul.mubr.bf16.gmra.mrb[24].mxu0 %v6571_v57  ;;  %3090 = vmatmul.mubr.bf16.gmra.mrb[24].mxu1 %v6571_v57  ;;  %v6703_v57 = vld [vmem:[%s7307_s23 + $0x380] ss:$16 sps:$4 sm:$0xff]   ;;  %v6734_v6 = vld [vmem:[%s7307_s23 + $0x6c] ss:$16 sps:$4 sm:$0xff]  }
  0xe5   : > { %2393 = vmatprep.mubr.bf16.mxu0 %v6578_v58  ;;  %3099 = vmatprep.mubr.bf16.mxu1 %v6578_v58  ;;  %v6710_v58 = vld [vmem:[%s7307_s23 + $0x3a4] ss:$16 sps:$4 sm:$0xff]  }
  0xe6   : > { %2669 = vmatpush1.bf16.msra.mxu0 %v6680_v3  ;;  %3375 = vmatpush1.bf16.msra.mxu1 %v6683_v5  ;;  %v6730_v3 = vld [vmem:[%s7307_s23 + $0x28] ss:$16 sps:$4 sm:$0xff]  }
  0xe7   : > { %2670 = vmatprep.subr.bf16.mxu0 %v6694_v12  ;;  %3376 = vmatprep.subr.bf16.mxu1 %v6697_v14  ;;  %v6733_v5 = vld [vmem:[%s7307_s23 + $0x48] ss:$16 sps:$4 sm:$0xff]   ;;  %v6743_v12 = vld [vmem:[%s7307_s23 + $0xcc] ss:$16 sps:$4 sm:$0xff]  }
  0xe8   : > { %v6746_v14 = vld [vmem:[%s7307_s23 + $0xec] ss:$16 sps:$4 sm:$0xff]  }
  0xea   : > { %2671 = vmatpush1.bf16.msra.mxu0 %v6692_v11  ;;  %3377 = vmatpush1.bf16.msra.mxu1 %v6695_v13  ;;  %v6742_v11 = vld [vmem:[%s7307_s23 + $0xa8] ss:$16 sps:$4 sm:$0xff]  }
  0xeb   : > { %2672 = vmatprep.subr.bf16.mxu0 %v6706_v20  ;;  %3378 = vmatprep.subr.bf16.mxu1 %v6709_v22  ;;  %v6745_v13 = vld [vmem:[%s7307_s23 + $0xc8] ss:$16 sps:$4 sm:$0xff]   ;;  %v6755_v20 = vld [vmem:[%s7307_s23 + $0x14c] ss:$16 sps:$4 sm:$0xff]  }
  0xec   : > { %2394 = vmatmul.mubr.bf16.gmra.mrb[28].mxu0 %v6580_v63  ;;  %3100 = vmatmul.mubr.bf16.gmra.mrb[28].mxu1 %v6580_v63  ;;  %v6724_v63 = vld [vmem:[%s7307_s23 + $0x3e0] ss:$16 sps:$4 sm:$0xff]   ;;  %v6758_v22 = vld [vmem:[%s7307_s23 + $0x16c] ss:$16 sps:$4 sm:$0xff]  }
  0xed   : > { %2403 = vmatprep.mubr.bf16.mxu0 %v6581_v0  ;;  %3109 = vmatprep.mubr.bf16.mxu1 %v6581_v0  ;;  %v6727_v0 = vld [vmem:[%s7307_s23 + $0xc] ss:$16 sps:$4 sm:$0xff]  }
  0xee   : > { %2673 = vmatpush1.bf16.msra.mxu0 %v6704_v19  ;;  %3379 = vmatpush1.bf16.msra.mxu1 %v6707_v21  ;;  %v6754_v19 = vld [vmem:[%s7307_s23 + $0x128] ss:$16 sps:$4 sm:$0xff]  }
  0xef   : > { %2674 = vmatprep.subr.bf16.mxu0 %v6718_v28  ;;  %3380 = vmatprep.subr.bf16.mxu1 %v6721_v30  ;;  %v6757_v21 = vld [vmem:[%s7307_s23 + $0x148] ss:$16 sps:$4 sm:$0xff]   ;;  %v6767_v28 = vld [vmem:[%s7307_s23 + $0x1cc] ss:$16 sps:$4 sm:$0xff]  }
  0xf0   : > { %v6770_v30 = vld [vmem:[%s7307_s23 + $0x1ec] ss:$16 sps:$4 sm:$0xff]  }
  0xf2   : > { %2675 = vmatpush1.bf16.msra.mxu0 %v6716_v27  ;;  %3381 = vmatpush1.bf16.msra.mxu1 %v6719_v29  ;;  %v6766_v27 = vld [vmem:[%s7307_s23 + $0x1a8] ss:$16 sps:$4 sm:$0xff]  }
  0xf3   : > { %v6769_v29 = vld [vmem:[%s7307_s23 + $0x1c8] ss:$16 sps:$4 sm:$0xff]  }
  0xf4   : > { %2404 = vmatmul.mubr.bf16.gmra.mrb[32].mxu0 %v6583_v1  ;;  %3110 = vmatmul.mubr.bf16.gmra.mrb[32].mxu1 %v6583_v1  ;;  %v6725_v1 = vld [vmem:[%s7307_s23 + $0x8] ss:$16 sps:$4 sm:$0xff]  }
  0xf5   : > { %2413 = vmatprep.mubr.bf16.mxu0 %v6590_v2  ;;  %3119 = vmatprep.mubr.bf16.mxu1 %v6590_v2  ;;  %v6728_v2 = vld [vmem:[%s7307_s23 + $0x2c] ss:$16 sps:$4 sm:$0xff]  }
  0xfc   : > { %2414 = vmatmul.mubr.bf16.gmra.mrb[36].mxu0 %v6592_v7  ;;  %3120 = vmatmul.mubr.bf16.gmra.mrb[36].mxu1 %v6592_v7  ;;  %v6736_v7 = vld [vmem:[%s7307_s23 + $0x68] ss:$16 sps:$4 sm:$0xff]  }
  0xfd   : > { %2423 = vmatprep.mubr.bf16.mxu0 %v6593_v8  ;;  %3129 = vmatprep.mubr.bf16.mxu1 %v6593_v8  ;;  %v6737_v8 = vld [vmem:[%s7307_s23 + $0x8c] ss:$16 sps:$4 sm:$0xff]  }
 0x104   : > { %2424 = vmatmul.mubr.bf16.gmra.mrb[40].mxu0 %v6595_v9  ;;  %3130 = vmatmul.mubr.bf16.gmra.mrb[40].mxu1 %v6595_v9  ;;  %v6739_v9 = vld [vmem:[%s7307_s23 + $0x88] ss:$16 sps:$4 sm:$0xff]  }
 0x105   : > { %2433 = vmatprep.mubr.bf16.mxu0 %v6602_v10  ;;  %3139 = vmatprep.mubr.bf16.mxu1 %v6602_v10  ;;  %v6740_v10 = vld [vmem:[%s7307_s23 + $0xac] ss:$16 sps:$4 sm:$0xff]  }
 0x10c   : > { %2434 = vmatmul.mubr.bf16.gmra.mrb[44].mxu0 %v6604_v15  ;;  %3140 = vmatmul.mubr.bf16.gmra.mrb[44].mxu1 %v6604_v15  ;;  %v6748_v15 = vld [vmem:[%s7307_s23 + $0xe8] ss:$16 sps:$4 sm:$0xff]  }
 0x10d   : > { %2443 = vmatprep.mubr.bf16.mxu0 %v6605_v16  ;;  %3149 = vmatprep.mubr.bf16.mxu1 %v6605_v16  ;;  %v6749_v16 = vld [vmem:[%s7307_s23 + $0x10c] ss:$16 sps:$4 sm:$0xff]  }
 0x114   : > { %2444 = vmatmul.mubr.bf16.gmra.mrb[48].mxu0 %v6607_v17  ;;  %3150 = vmatmul.mubr.bf16.gmra.mrb[48].mxu1 %v6607_v17  ;;  %v6751_v17 = vld [vmem:[%s7307_s23 + $0x108] ss:$16 sps:$4 sm:$0xff]  }
 0x115   : > { %2453 = vmatprep.mubr.bf16.mxu0 %v6614_v18  ;;  %3159 = vmatprep.mubr.bf16.mxu1 %v6614_v18  ;;  %v6752_v18 = vld [vmem:[%s7307_s23 + $0x12c] ss:$16 sps:$4 sm:$0xff]  }
 0x11c   : > { %2454 = vmatmul.mubr.bf16.gmra.mrb[52].mxu0 %v6616_v23  ;;  %3160 = vmatmul.mubr.bf16.gmra.mrb[52].mxu1 %v6616_v23  ;;  %v6760_v23 = vld [vmem:[%s7307_s23 + $0x168] ss:$16 sps:$4 sm:$0xff]  }
 0x11d   : > { %2463 = vmatprep.mubr.bf16.mxu0 %v6617_v24  ;;  %3169 = vmatprep.mubr.bf16.mxu1 %v6617_v24  ;;  %v6761_v24 = vld [vmem:[%s7307_s23 + $0x18c] ss:$16 sps:$4 sm:$0xff]  }
 0x124   : > { %2464 = vmatmul.mubr.bf16.gmra.mrb[56].mxu0 %v6619_v25  ;;  %3170 = vmatmul.mubr.bf16.gmra.mrb[56].mxu1 %v6619_v25  ;;  %v6763_v25 = vld [vmem:[%s7307_s23 + $0x188] ss:$16 sps:$4 sm:$0xff]  }
 0x125   : > { %2473 = vmatprep.mubr.bf16.mxu0 %v6626_v26  ;;  %3179 = vmatprep.mubr.bf16.mxu1 %v6626_v26  ;;  %v6764_v26 = vld [vmem:[%s7307_s23 + $0x1ac] ss:$16 sps:$4 sm:$0xff]  }
 0x12c   : > { %2474 = vmatmul.mubr.bf16.gmra.mrb[60].mxu0 %v6628_v31  ;;  %3180 = vmatmul.mubr.bf16.gmra.mrb[60].mxu1 %v6628_v31  ;;  %v6772_v31 = vld [vmem:[%s7307_s23 + $0x1e8] ss:$16 sps:$4 sm:$0xff]  }
 0x12d   : > { %2483 = vmatprep.mubr.bf16.mxu0 %v6629_v32  ;;  %3189 = vmatprep.mubr.bf16.mxu1 %v6629_v32  ;;  %v6773_v32 = vld [vmem:[%s7307_s23 + $0x20c] ss:$16 sps:$4 sm:$0xff]  }
 0x134   : > { %2484 = vmatmul.mubr.bf16.gmra.mrb[64].mxu0 %v6631_v33  ;;  %3190 = vmatmul.mubr.bf16.gmra.mrb[64].mxu1 %v6631_v33  ;;  %v6775_v33 = vld [vmem:[%s7307_s23 + $0x208] ss:$16 sps:$4 sm:$0xff]  }
 0x135   : > { %2493 = vmatprep.mubr.bf16.mxu0 %v6638_v34  ;;  %3199 = vmatprep.mubr.bf16.mxu1 %v6638_v34  ;;  %v6776_v34 = vld [vmem:[%s7307_s23 + $0x22c] ss:$16 sps:$4 sm:$0xff]  }
 0x13c   : > { %2494 = vmatmul.mubr.bf16.gmra.mrb[68].mxu0 %v6640_v35  ;;  %3200 = vmatmul.mubr.bf16.gmra.mrb[68].mxu1 %v6640_v35  ;;  %v6778_v35 = vld [vmem:[%s7307_s23 + $0x228] ss:$16 sps:$4 sm:$0xff]  }
 0x13d   : > { %2503 = vmatprep.mubr.bf16.mxu0 %v6641_v36  ;;  %3209 = vmatprep.mubr.bf16.mxu1 %v6641_v36  ;;  %v6779_v36 = vld [vmem:[%s7307_s23 + $0x24c] ss:$16 sps:$4 sm:$0xff]  }
 0x144   : > { %2504 = vmatmul.mubr.bf16.gmra.mrb[72].mxu0 %v6643_v37  ;;  %3210 = vmatmul.mubr.bf16.gmra.mrb[72].mxu1 %v6643_v37  ;;  %v6781_v37 = vld [vmem:[%s7307_s23 + $0x248] ss:$16 sps:$4 sm:$0xff]  }
 0x145   : > { %2513 = vmatprep.mubr.bf16.mxu0 %v6650_v38  ;;  %3219 = vmatprep.mubr.bf16.mxu1 %v6650_v38  ;;  %v6782_v38 = vld [vmem:[%s7307_s23 + $0x26c] ss:$16 sps:$4 sm:$0xff]  }
 0x14c   : > { %2514 = vmatmul.mubr.bf16.gmra.mrb[76].mxu0 %v6652_v39  ;;  %3220 = vmatmul.mubr.bf16.gmra.mrb[76].mxu1 %v6652_v39  ;;  %v6784_v39 = vld [vmem:[%s7307_s23 + $0x268] ss:$16 sps:$4 sm:$0xff]  }
 0x14d   : > { %2523 = vmatprep.mubr.bf16.mxu0 %v6653_v40  ;;  %3229 = vmatprep.mubr.bf16.mxu1 %v6653_v40  ;;  %v6785_v40 = vld [vmem:[%s7307_s23 + $0x28c] ss:$16 sps:$4 sm:$0xff]  }
 0x154   : > { %2524 = vmatmul.mubr.bf16.gmra.mrb[80].mxu0 %v6655_v41  ;;  %3230 = vmatmul.mubr.bf16.gmra.mrb[80].mxu1 %v6655_v41  ;;  %v6787_v41 = vld [vmem:[%s7307_s23 + $0x288] ss:$16 sps:$4 sm:$0xff]  }
 0x155   : > { %2533 = vmatprep.mubr.bf16.mxu0 %v6662_v42  ;;  %3239 = vmatprep.mubr.bf16.mxu1 %v6662_v42  ;;  %v6788_v42 = vld [vmem:[%s7307_s23 + $0x2ac] ss:$16 sps:$4 sm:$0xff]  }
 0x15c   : > { %2534 = vmatmul.mubr.bf16.gmra.mrb[84].mxu0 %v6664_v43  ;;  %3240 = vmatmul.mubr.bf16.gmra.mrb[84].mxu1 %v6664_v43  ;;  %v6790_v43 = vld [vmem:[%s7307_s23 + $0x2a8] ss:$16 sps:$4 sm:$0xff]  }
 0x15d   : > { %2543 = vmatprep.mubr.bf16.mxu0 %v6665_v44  ;;  %3249 = vmatprep.mubr.bf16.mxu1 %v6665_v44  ;;  %v6791_v44 = vld [vmem:[%s7307_s23 + $0x2cc] ss:$16 sps:$4 sm:$0xff]  }
 0x164   : > { %2544 = vmatmul.mubr.bf16.gmra.mrb[88].mxu0 %v6667_v45  ;;  %3250 = vmatmul.mubr.bf16.gmra.mrb[88].mxu1 %v6667_v45  ;;  %v6793_v45 = vld [vmem:[%s7307_s23 + $0x2c8] ss:$16 sps:$4 sm:$0xff]  }
 0x165   : > { %2553 = vmatprep.mubr.bf16.mxu0 %v6674_v46  ;;  %3259 = vmatprep.mubr.bf16.mxu1 %v6674_v46  ;;  %v6794_v46 = vld [vmem:[%s7307_s23 + $0x2ec] ss:$16 sps:$4 sm:$0xff]  }
 0x16c   : > { %2554 = vmatmul.mubr.bf16.gmra.mrb[92].mxu0 %v6676_v47  ;;  %3260 = vmatmul.mubr.bf16.gmra.mrb[92].mxu1 %v6676_v47  ;;  %v6796_v47 = vld [vmem:[%s7307_s23 + $0x2e8] ss:$16 sps:$4 sm:$0xff]  }
 0x16d   : > { %2563 = vmatprep.mubr.bf16.mxu0 %v6677_v48  ;;  %3269 = vmatprep.mubr.bf16.mxu1 %v6677_v48  ;;  %v6797_v48 = vld [vmem:[%s7307_s23 + $0x30c] ss:$16 sps:$4 sm:$0xff]  }
 0x174   : > { %2564 = vmatmul.mubr.bf16.gmra.mrb[96].mxu0 %v6679_v49  ;;  %3270 = vmatmul.mubr.bf16.gmra.mrb[96].mxu1 %v6679_v49  ;;  %v6799_v49 = vld [vmem:[%s7307_s23 + $0x308] ss:$16 sps:$4 sm:$0xff]  }
 0x175   : > { %2573 = vmatprep.mubr.bf16.mxu0 %v6686_v50  ;;  %3279 = vmatprep.mubr.bf16.mxu1 %v6686_v50  ;;  %v6800_v50 = vld [vmem:[%s7307_s23 + $0x32c] ss:$16 sps:$4 sm:$0xff]  }
 0x17c   : > { %2574 = vmatmul.mubr.bf16.gmra.mrb[100].mxu0 %v6688_v51  ;;  %3280 = vmatmul.mubr.bf16.gmra.mrb[100].mxu1 %v6688_v51  ;;  %v6802_v51 = vld [vmem:[%s7307_s23 + $0x328] ss:$16 sps:$4 sm:$0xff]  }
 0x17d   : > { %2583 = vmatprep.mubr.bf16.mxu0 %v6689_v52  ;;  %3289 = vmatprep.mubr.bf16.mxu1 %v6689_v52  ;;  %v6803_v52 = vld [vmem:[%s7307_s23 + $0x34c] ss:$16 sps:$4 sm:$0xff]  }
 0x184   : > { %2584 = vmatmul.mubr.bf16.gmra.mrb[104].mxu0 %v6691_v53  ;;  %3290 = vmatmul.mubr.bf16.gmra.mrb[104].mxu1 %v6691_v53  ;;  %v6805_v53 = vld [vmem:[%s7307_s23 + $0x348] ss:$16 sps:$4 sm:$0xff]  }
 0x185   : > { %2593 = vmatprep.mubr.bf16.mxu0 %v6698_v54  ;;  %3299 = vmatprep.mubr.bf16.mxu1 %v6698_v54  ;;  %v6806_v54 = vld [vmem:[%s7307_s23 + $0x36c] ss:$16 sps:$4 sm:$0xff]  }
 0x18c   : > { %2594 = vmatmul.mubr.bf16.gmra.mrb[108].mxu0 %v6700_v55  ;;  %3300 = vmatmul.mubr.bf16.gmra.mrb[108].mxu1 %v6700_v55 }
 0x18d   : > { %2603 = vmatprep.mubr.bf16.mxu0 %v6701_v56  ;;  %3309 = vmatprep.mubr.bf16.mxu1 %v6701_v56 }
 0x194   : > { %2604 = vmatmul.mubr.bf16.gmra.mrb[112].mxu0 %v6703_v57  ;;  %3310 = vmatmul.mubr.bf16.gmra.mrb[112].mxu1 %v6703_v57 }
 0x195   : > { %2613 = vmatprep.mubr.bf16.mxu0 %v6710_v58  ;;  %3319 = vmatprep.mubr.bf16.mxu1 %v6710_v58 }
 0x19c   : > { %2614 = vmatmul.mubr.bf16.gmra.mrb[116].mxu0 %v6712_v59  ;;  %3320 = vmatmul.mubr.bf16.gmra.mrb[116].mxu1 %v6712_v59  ;;  %v6808_v59 = vld [vmem:[%s7307_s23 + $0x368] ss:$16 sps:$4 sm:$0xff]  }
 0x19d   : > { %2623 = vmatprep.mubr.bf16.mxu0 %v6713_v60  ;;  %3329 = vmatprep.mubr.bf16.mxu1 %v6713_v60 }
 0x1a4   : > { %2624 = vmatmul.mubr.bf16.gmra.mrb[120].mxu0 %v6715_v61  ;;  %3330 = vmatmul.mubr.bf16.gmra.mrb[120].mxu1 %v6715_v61 }
 0x1a5   : > { %2633 = vmatprep.mubr.bf16.mxu0 %v6722_v62  ;;  %3339 = vmatprep.mubr.bf16.mxu1 %v6722_v62 }
 0x1ac   : > { %2634 = vmatmul.mubr.bf16.gmra.mrb[124].mxu0 %v6724_v63  ;;  %3340 = vmatmul.mubr.bf16.gmra.mrb[124].mxu1 %v6724_v63 }
 0x1ad   : > { %2676 = vmatprep.mubr.bf16.mxu0 %v6727_v0  ;;  %3382 = vmatprep.mubr.bf16.mxu1 %v6727_v0  ;;  %v6809_v0 = vld [vmem:[%s7307_s23 + $0x38c] ss:$16 sps:$4 sm:$0xff]  }
 0x1b4   : > { %2677 = vmatmul.mubr.bf16.vlgmr.msra.gmra.mrb[0].mxu0 %v6725_v1  ;;  %3383 = vmatmul.mubr.bf16.vlgmr.msra.gmra.mrb[0].mxu1 %v6725_v1 }
 0x1b5   : > { %2686 = vmatprep.mubr.bf16.mxu0 %v6728_v2  ;;  %3392 = vmatprep.mubr.bf16.mxu1 %v6728_v2 }
 0x1bc   : > { %2687 = vmatmul.mubr.bf16.gmra.mrb[4].mxu0 %v6730_v3  ;;  %3393 = vmatmul.mubr.bf16.gmra.mrb[4].mxu1 %v6730_v3 }
 0x1bd   : > { %2696 = vmatprep.mubr.bf16.mxu0 %v6731_v4  ;;  %3402 = vmatprep.mubr.bf16.mxu1 %v6731_v4 }
 0x1c4   : > { %2697 = vmatmul.mubr.bf16.gmra.mrb[8].mxu0 %v6733_v5  ;;  %3403 = vmatmul.mubr.bf16.gmra.mrb[8].mxu1 %v6733_v5 }
 0x1c5   : > { %2706 = vmatprep.mubr.bf16.mxu0 %v6734_v6  ;;  %3412 = vmatprep.mubr.bf16.mxu1 %v6734_v6 }
 0x1cc   : > { %2707 = vmatmul.mubr.bf16.gmra.mrb[12].mxu0 %v6736_v7  ;;  %3413 = vmatmul.mubr.bf16.gmra.mrb[12].mxu1 %v6736_v7 }
 0x1cd   : > { %2716 = vmatprep.mubr.bf16.mxu0 %v6737_v8  ;;  %3422 = vmatprep.mubr.bf16.mxu1 %v6737_v8 }
 0x1d4   : > { %2717 = vmatmul.mubr.bf16.gmra.mrb[16].mxu0 %v6739_v9  ;;  %3423 = vmatmul.mubr.bf16.gmra.mrb[16].mxu1 %v6739_v9  ;;  %v6811_v9 = vld [vmem:[%s7307_s23 + $0x388] ss:$16 sps:$4 sm:$0xff]  }
 0x1d5   : > { %2726 = vmatprep.mubr.bf16.mxu0 %v6740_v10  ;;  %3432 = vmatprep.mubr.bf16.mxu1 %v6740_v10 }
 0x1dc   : > { %2727 = vmatmul.mubr.bf16.gmra.mrb[20].mxu0 %v6742_v11  ;;  %3433 = vmatmul.mubr.bf16.gmra.mrb[20].mxu1 %v6742_v11 }
 0x1dd   : > { %2736 = vmatprep.mubr.bf16.mxu0 %v6743_v12  ;;  %3442 = vmatprep.mubr.bf16.mxu1 %v6743_v12 }
 0x1e4   : > { %2737 = vmatmul.mubr.bf16.gmra.mrb[24].mxu0 %v6745_v13  ;;  %3443 = vmatmul.mubr.bf16.gmra.mrb[24].mxu1 %v6745_v13 }
 0x1e5   : > { %2746 = vmatprep.mubr.bf16.mxu0 %v6746_v14  ;;  %3452 = vmatprep.mubr.bf16.mxu1 %v6746_v14  ;;  %v6812_v14 = vld [vmem:[%s7307_s23 + $0x3ac] ss:$16 sps:$4 sm:$0xff]  }
 0x1ec   : > { %2747 = vmatmul.mubr.bf16.gmra.mrb[28].mxu0 %v6748_v15  ;;  %3453 = vmatmul.mubr.bf16.gmra.mrb[28].mxu1 %v6748_v15 }
 0x1ed   : > { %2756 = vmatprep.mubr.bf16.mxu0 %v6749_v16  ;;  %3462 = vmatprep.mubr.bf16.mxu1 %v6749_v16 }
 0x1f4   : > { %2757 = vmatmul.mubr.bf16.gmra.mrb[32].mxu0 %v6751_v17  ;;  %3463 = vmatmul.mubr.bf16.gmra.mrb[32].mxu1 %v6751_v17 }
 0x1f5   : > { %2766 = vmatprep.mubr.bf16.mxu0 %v6752_v18  ;;  %3472 = vmatprep.mubr.bf16.mxu1 %v6752_v18 }
 0x1fc   : > { %2767 = vmatmul.mubr.bf16.gmra.mrb[36].mxu0 %v6754_v19  ;;  %3473 = vmatmul.mubr.bf16.gmra.mrb[36].mxu1 %v6754_v19 }
 0x1fd   : > { %2776 = vmatprep.mubr.bf16.mxu0 %v6755_v20  ;;  %3482 = vmatprep.mubr.bf16.mxu1 %v6755_v20 }
 0x204   : > { %2777 = vmatmul.mubr.bf16.gmra.mrb[40].mxu0 %v6757_v21  ;;  %3483 = vmatmul.mubr.bf16.gmra.mrb[40].mxu1 %v6757_v21 }
 0x205   : > { %2786 = vmatprep.mubr.bf16.mxu0 %v6758_v22  ;;  %3492 = vmatprep.mubr.bf16.mxu1 %v6758_v22 }
 0x20c   : > { %2787 = vmatmul.mubr.bf16.gmra.mrb[44].mxu0 %v6760_v23  ;;  %3493 = vmatmul.mubr.bf16.gmra.mrb[44].mxu1 %v6760_v23  ;;  %v6814_v23 = vld [vmem:[%s7307_s23 + $0x3a8] ss:$16 sps:$4 sm:$0xff]  }
 0x20d   : > { %2796 = vmatprep.mubr.bf16.mxu0 %v6761_v24  ;;  %3502 = vmatprep.mubr.bf16.mxu1 %v6761_v24 }
 0x214   : > { %2797 = vmatmul.mubr.bf16.gmra.mrb[48].mxu0 %v6763_v25  ;;  %3503 = vmatmul.mubr.bf16.gmra.mrb[48].mxu1 %v6763_v25 }
 0x215   : > { %2806 = vmatprep.mubr.bf16.mxu0 %v6764_v26  ;;  %3512 = vmatprep.mubr.bf16.mxu1 %v6764_v26 }
 0x21c   : > { %2807 = vmatmul.mubr.bf16.gmra.mrb[52].mxu0 %v6766_v27  ;;  %3513 = vmatmul.mubr.bf16.gmra.mrb[52].mxu1 %v6766_v27 }
 0x21d   : > { %2816 = vmatprep.mubr.bf16.mxu0 %v6767_v28  ;;  %3522 = vmatprep.mubr.bf16.mxu1 %v6767_v28  ;;  %v6815_v28 = vld [vmem:[%s7307_s23 + $0x3cc] ss:$16 sps:$4 sm:$0xff]  }
 0x224   : > { %2817 = vmatmul.mubr.bf16.gmra.mrb[56].mxu0 %v6769_v29  ;;  %3523 = vmatmul.mubr.bf16.gmra.mrb[56].mxu1 %v6769_v29 }
 0x225   : > { %2826 = vmatprep.mubr.bf16.mxu0 %v6770_v30  ;;  %3532 = vmatprep.mubr.bf16.mxu1 %v6770_v30 }
 0x22c   : > { %2827 = vmatmul.mubr.bf16.gmra.mrb[60].mxu0 %v6772_v31  ;;  %3533 = vmatmul.mubr.bf16.gmra.mrb[60].mxu1 %v6772_v31 }
 0x22d   : > { %2836 = vmatprep.mubr.bf16.mxu0 %v6773_v32  ;;  %3542 = vmatprep.mubr.bf16.mxu1 %v6773_v32 }
 0x234   : > { %2837 = vmatmul.mubr.bf16.gmra.mrb[64].mxu0 %v6775_v33  ;;  %3543 = vmatmul.mubr.bf16.gmra.mrb[64].mxu1 %v6775_v33 }
 0x235   : > { %2846 = vmatprep.mubr.bf16.mxu0 %v6776_v34  ;;  %3552 = vmatprep.mubr.bf16.mxu1 %v6776_v34 }
 0x23c   : > { %2847 = vmatmul.mubr.bf16.gmra.mrb[68].mxu0 %v6778_v35  ;;  %3553 = vmatmul.mubr.bf16.gmra.mrb[68].mxu1 %v6778_v35 }
 0x23d   : > { %2856 = vmatprep.mubr.bf16.mxu0 %v6779_v36  ;;  %3562 = vmatprep.mubr.bf16.mxu1 %v6779_v36 }
 0x244   : > { %2857 = vmatmul.mubr.bf16.gmra.mrb[72].mxu0 %v6781_v37  ;;  %3563 = vmatmul.mubr.bf16.gmra.mrb[72].mxu1 %v6781_v37  ;;  %v6817_v37 = vld [vmem:[%s7307_s23 + $0x3c8] ss:$16 sps:$4 sm:$0xff]  }
 0x245   : > { %2866 = vmatprep.mubr.bf16.mxu0 %v6782_v38  ;;  %3572 = vmatprep.mubr.bf16.mxu1 %v6782_v38 }
 0x24c   : > { %2867 = vmatmul.mubr.bf16.gmra.mrb[76].mxu0 %v6784_v39  ;;  %3573 = vmatmul.mubr.bf16.gmra.mrb[76].mxu1 %v6784_v39 }
 0x24d   : > { %2876 = vmatprep.mubr.bf16.mxu0 %v6785_v40  ;;  %3582 = vmatprep.mubr.bf16.mxu1 %v6785_v40 }
 0x254   : > { %2877 = vmatmul.mubr.bf16.gmra.mrb[80].mxu0 %v6787_v41  ;;  %3583 = vmatmul.mubr.bf16.gmra.mrb[80].mxu1 %v6787_v41 }
 0x255   : > { %2886 = vmatprep.mubr.bf16.mxu0 %v6788_v42  ;;  %3592 = vmatprep.mubr.bf16.mxu1 %v6788_v42  ;;  %v6818_v42 = vld [vmem:[%s7307_s23 + $0x3ec] ss:$16 sps:$4 sm:$0xff]  }
 0x25c   : > { %2887 = vmatmul.mubr.bf16.gmra.mrb[84].mxu0 %v6790_v43  ;;  %3593 = vmatmul.mubr.bf16.gmra.mrb[84].mxu1 %v6790_v43 }
 0x25d   : > { %2896 = vmatprep.mubr.bf16.mxu0 %v6791_v44  ;;  %3602 = vmatprep.mubr.bf16.mxu1 %v6791_v44 }
 0x264   : > { %2897 = vmatmul.mubr.bf16.gmra.mrb[88].mxu0 %v6793_v45  ;;  %3603 = vmatmul.mubr.bf16.gmra.mrb[88].mxu1 %v6793_v45 }
 0x265   : > { %2906 = vmatprep.mubr.bf16.mxu0 %v6794_v46  ;;  %3612 = vmatprep.mubr.bf16.mxu1 %v6794_v46 }
 0x26c   : > { %2907 = vmatmul.mubr.bf16.gmra.mrb[92].mxu0 %v6796_v47  ;;  %3613 = vmatmul.mubr.bf16.gmra.mrb[92].mxu1 %v6796_v47 }
 0x26d   : > { %2916 = vmatprep.mubr.bf16.mxu0 %v6797_v48  ;;  %3622 = vmatprep.mubr.bf16.mxu1 %v6797_v48 }
 0x274   : > { %2917 = vmatmul.mubr.bf16.gmra.mrb[96].mxu0 %v6799_v49  ;;  %3623 = vmatmul.mubr.bf16.gmra.mrb[96].mxu1 %v6799_v49 }
 0x275   : > { %2926 = vmatprep.mubr.bf16.mxu0 %v6800_v50  ;;  %3632 = vmatprep.mubr.bf16.mxu1 %v6800_v50 }
 0x27c   : > { %2927 = vmatmul.mubr.bf16.gmra.mrb[100].mxu0 %v6802_v51  ;;  %3633 = vmatmul.mubr.bf16.gmra.mrb[100].mxu1 %v6802_v51  ;;  %v6820_v51 = vld [vmem:[%s7307_s23 + $0x3e8] ss:$16 sps:$4 sm:$0xff]   ;;  %s7711_s23 = scalar_lea.hbm %s7842_s8, %s5909_s19 }
 0x27d   : > { %2936 = vmatprep.mubr.bf16.mxu0 %v6803_v52  ;;  %3642 = vmatprep.mubr.bf16.mxu1 %v6803_v52 }
 0x284   : > { %2937 = vmatmul.mubr.bf16.gmra.mrb[104].mxu0 %v6805_v53  ;;  %3643 = vmatmul.mubr.bf16.gmra.mrb[104].mxu1 %v6805_v53 }
 0x285   : > { %2946 = vmatprep.mubr.bf16.mxu0 %v6806_v54  ;;  %3652 = vmatprep.mubr.bf16.mxu1 %v6806_v54 }
 0x287   : > { %v2678_v55 = vpop.f32.mrb[0].mxu0  ;;  %v3384_v56 = vpop.f32.mrb[0].mxu1 }
 0x288   : > { %v2680_v57 = vpop.f32.mrb[1].mxu0  ;;  %v3386_v58 = vpop.f32.mrb[1].mxu1 }
 0x289   : > { %v5915_v60 = vpack.c.bf16 %v2680_v57, %v2678_v55  ;;  %v5916_v61 = vpack.c.bf16 %v3386_v58, %v3384_v56  ;;  %v2682_v62 = vpop.f32.mrb[2].mxu0  ;;  %v3388_v63 = vpop.f32.mrb[2].mxu1 }
 0x28a   : > { %v2684_v1 = vpop.f32.mrb[3].mxu0  ;;  %v3390_v2 = vpop.f32.mrb[3].mxu1 }
 0x28b   : > { %5242 = vst [vmem:[%s7572_s12] sm:$0xff] %v5915_v60  ;;  %5243 = vst [vmem:[%s7572_s12 + $0x8] sm:$0xff] %v5916_v61  ;;  %v5917_v3 = vpack.c.bf16 %v2684_v1, %v2682_v62  ;;  %v5918_v4 = vpack.c.bf16 %v3390_v2, %v3388_v63 }
 0x28c   : > { %2947 = vmatmul.mubr.bf16.gmra.mrb[108].mxu0 %v6808_v59  ;;  %3653 = vmatmul.mubr.bf16.gmra.mrb[108].mxu1 %v6808_v59 }
 0x28d   : > { %5244 = vst [vmem:[%s7572_s12 + $0x10] sm:$0xff] %v5917_v3  ;;  %5245 = vst [vmem:[%s7572_s12 + $0x18] sm:$0xff] %v5918_v4  ;;  %2956 = vmatprep.mubr.bf16.mxu0 %v6809_v0  ;;  %3662 = vmatprep.mubr.bf16.mxu1 %v6809_v0 }
 0x28f   : > { %v2688_v5 = vpop.f32.mrb[4].mxu0  ;;  %v3394_v6 = vpop.f32.mrb[4].mxu1 }
 0x290   : > { %v2690_v7 = vpop.f32.mrb[5].mxu0  ;;  %v3396_v8 = vpop.f32.mrb[5].mxu1 }
 0x291   : > { %v5919_v10 = vpack.c.bf16 %v2690_v7, %v2688_v5  ;;  %v5920_v11 = vpack.c.bf16 %v3396_v8, %v3394_v6  ;;  %v2692_v12 = vpop.f32.mrb[6].mxu0  ;;  %v3398_v13 = vpop.f32.mrb[6].mxu1 }
 0x292   : > { %v2694_v15 = vpop.f32.mrb[7].mxu0  ;;  %v3400_v16 = vpop.f32.mrb[7].mxu1 }
 0x293   : > { %5246 = vst [vmem:[%s7572_s12 + $0x20] sm:$0xff] %v5919_v10  ;;  %5247 = vst [vmem:[%s7572_s12 + $0x28] sm:$0xff] %v5920_v11  ;;  %v5921_v17 = vpack.c.bf16 %v2694_v15, %v2692_v12  ;;  %v5922_v18 = vpack.c.bf16 %v3400_v16, %v3398_v13 }
 0x294   : > { %2957 = vmatmul.mubr.bf16.gmra.mrb[112].mxu0 %v6811_v9  ;;  %3663 = vmatmul.mubr.bf16.gmra.mrb[112].mxu1 %v6811_v9 }
 0x295   : > { %5248 = vst [vmem:[%s7572_s12 + $0x30] sm:$0xff] %v5921_v17  ;;  %5249 = vst [vmem:[%s7572_s12 + $0x38] sm:$0xff] %v5922_v18  ;;  %2966 = vmatprep.mubr.bf16.mxu0 %v6812_v14  ;;  %3672 = vmatprep.mubr.bf16.mxu1 %v6812_v14 }
 0x297   : > { %v2698_v19 = vpop.f32.mrb[8].mxu0  ;;  %v3404_v20 = vpop.f32.mrb[8].mxu1 }
 0x298   : > { %v2700_v21 = vpop.f32.mrb[9].mxu0  ;;  %v3406_v22 = vpop.f32.mrb[9].mxu1 }
 0x299   : > { %v5923_v24 = vpack.c.bf16 %v2700_v21, %v2698_v19  ;;  %v5924_v25 = vpack.c.bf16 %v3406_v22, %v3404_v20  ;;  %v2702_v26 = vpop.f32.mrb[10].mxu0  ;;  %v3408_v27 = vpop.f32.mrb[10].mxu1 }
 0x29a   : > { %v2704_v29 = vpop.f32.mrb[11].mxu0  ;;  %v3410_v30 = vpop.f32.mrb[11].mxu1 }
 0x29b   : > { %5250 = vst [vmem:[%s7572_s12 + $0x40] sm:$0xff] %v5923_v24  ;;  %5251 = vst [vmem:[%s7572_s12 + $0x48] sm:$0xff] %v5924_v25  ;;  %v5925_v31 = vpack.c.bf16 %v2704_v29, %v2702_v26  ;;  %v5926_v32 = vpack.c.bf16 %v3410_v30, %v3408_v27 }
 0x29c   : > { %2967 = vmatmul.mubr.bf16.gmra.mrb[116].mxu0 %v6814_v23  ;;  %3673 = vmatmul.mubr.bf16.gmra.mrb[116].mxu1 %v6814_v23 }
 0x29d   : > { %5252 = vst [vmem:[%s7572_s12 + $0x50] sm:$0xff] %v5925_v31  ;;  %5253 = vst [vmem:[%s7572_s12 + $0x58] sm:$0xff] %v5926_v32  ;;  %2976 = vmatprep.mubr.bf16.mxu0 %v6815_v28  ;;  %3682 = vmatprep.mubr.bf16.mxu1 %v6815_v28 }
 0x29f   : > { %v2708_v33 = vpop.f32.mrb[12].mxu0  ;;  %v3414_v34 = vpop.f32.mrb[12].mxu1 }
 0x2a0   : > { %v2710_v35 = vpop.f32.mrb[13].mxu0  ;;  %v3416_v36 = vpop.f32.mrb[13].mxu1 }
 0x2a1   : > { %v5927_v38 = vpack.c.bf16 %v2710_v35, %v2708_v33  ;;  %v5928_v39 = vpack.c.bf16 %v3416_v36, %v3414_v34  ;;  %v2712_v40 = vpop.f32.mrb[14].mxu0  ;;  %v3418_v41 = vpop.f32.mrb[14].mxu1 }
 0x2a2   : > { %v2714_v43 = vpop.f32.mrb[15].mxu0  ;;  %v3420_v44 = vpop.f32.mrb[15].mxu1 }
 0x2a3   : > { %5254 = vst [vmem:[%s7572_s12 + $0x60] sm:$0xff] %v5927_v38  ;;  %5255 = vst [vmem:[%s7572_s12 + $0x68] sm:$0xff] %v5928_v39  ;;  %v5929_v45 = vpack.c.bf16 %v2714_v43, %v2712_v40  ;;  %v5930_v46 = vpack.c.bf16 %v3420_v44, %v3418_v41 }
 0x2a4   : > { %2977 = vmatmul.mubr.bf16.gmra.mrb[120].mxu0 %v6817_v37  ;;  %3683 = vmatmul.mubr.bf16.gmra.mrb[120].mxu1 %v6817_v37 }
 0x2a5   : > { %5256 = vst [vmem:[%s7572_s12 + $0x70] sm:$0xff] %v5929_v45  ;;  %5257 = vst [vmem:[%s7572_s12 + $0x78] sm:$0xff] %v5930_v46  ;;  %2986 = vmatprep.mubr.bf16.mxu0 %v6818_v42  ;;  %3692 = vmatprep.mubr.bf16.mxu1 %v6818_v42 }
 0x2a7   : > { %v2718_v47 = vpop.f32.mrb[16].mxu0  ;;  %v3424_v48 = vpop.f32.mrb[16].mxu1 }
 0x2a8   : > { %v2720_v49 = vpop.f32.mrb[17].mxu0  ;;  %v3426_v50 = vpop.f32.mrb[17].mxu1 }
 0x2a9   : > { %v5931_v52 = vpack.c.bf16 %v2720_v49, %v2718_v47  ;;  %v5932_v53 = vpack.c.bf16 %v3426_v50, %v3424_v48  ;;  %v2722_v54 = vpop.f32.mrb[18].mxu0  ;;  %v3428_v55 = vpop.f32.mrb[18].mxu1 }
 0x2aa   : > { %v2724_v56 = vpop.f32.mrb[19].mxu0  ;;  %v3430_v57 = vpop.f32.mrb[19].mxu1 }
 0x2ab   : > { %5258 = vst [vmem:[%s7572_s12 + $0x80] sm:$0xff] %v5931_v52  ;;  %5259 = vst [vmem:[%s7572_s12 + $0x88] sm:$0xff] %v5932_v53  ;;  %v5933_v58 = vpack.c.bf16 %v2724_v56, %v2722_v54  ;;  %v5934_v59 = vpack.c.bf16 %v3430_v57, %v3428_v55 }
 0x2ac   : > { %2987 = vmatmul.mubr.bf16.gmra.mrb[124].mxu0 %v6820_v51  ;;  %3693 = vmatmul.mubr.bf16.gmra.mrb[124].mxu1 %v6820_v51 }
 0x2ad   : > { %5260 = vst [vmem:[%s7572_s12 + $0x90] sm:$0xff] %v5933_v58  ;;  %5261 = vst [vmem:[%s7572_s12 + $0x98] sm:$0xff] %v5934_v59 }
 0x2af   : > { %v2728_v60 = vpop.f32.mrb[20].mxu0  ;;  %v3434_v61 = vpop.f32.mrb[20].mxu1 }
 0x2b0   : > { %v2730_v62 = vpop.f32.mrb[21].mxu0  ;;  %v3436_v63 = vpop.f32.mrb[21].mxu1 }
 0x2b1   : > { %v5935_v0 = vpack.c.bf16 %v2730_v62, %v2728_v60  ;;  %v5936_v1 = vpack.c.bf16 %v3436_v63, %v3434_v61  ;;  %v2732_v2 = vpop.f32.mrb[22].mxu0  ;;  %v3438_v3 = vpop.f32.mrb[22].mxu1 }
 0x2b2   : > { %v2734_v4 = vpop.f32.mrb[23].mxu0  ;;  %v3440_v5 = vpop.f32.mrb[23].mxu1 }
 0x2b3   : > { %5262 = vst [vmem:[%s7572_s12 + $0xa0] sm:$0xff] %v5935_v0  ;;  %5263 = vst [vmem:[%s7572_s12 + $0xa8] sm:$0xff] %v5936_v1  ;;  %v5937_v6 = vpack.c.bf16 %v2734_v4, %v2732_v2  ;;  %v5938_v7 = vpack.c.bf16 %v3440_v5, %v3438_v3 }
 0x2b5   : > { %5264 = vst [vmem:[%s7572_s12 + $0xb0] sm:$0xff] %v5937_v6  ;;  %5265 = vst [vmem:[%s7572_s12 + $0xb8] sm:$0xff] %v5938_v7 }
 0x2b7   : > { %v2738_v8 = vpop.f32.mrb[24].mxu0  ;;  %v3444_v9 = vpop.f32.mrb[24].mxu1 }
 0x2b8   : > { %v2740_v10 = vpop.f32.mrb[25].mxu0  ;;  %v3446_v11 = vpop.f32.mrb[25].mxu1 }
 0x2b9   : > { %v5939_v12 = vpack.c.bf16 %v2740_v10, %v2738_v8  ;;  %v5940_v13 = vpack.c.bf16 %v3446_v11, %v3444_v9  ;;  %v2742_v14 = vpop.f32.mrb[26].mxu0  ;;  %v3448_v15 = vpop.f32.mrb[26].mxu1 }
 0x2ba   : > { %v2744_v16 = vpop.f32.mrb[27].mxu0  ;;  %v3450_v17 = vpop.f32.mrb[27].mxu1 }
 0x2bb   : > { %5266 = vst [vmem:[%s7572_s12 + $0xc0] sm:$0xff] %v5939_v12  ;;  %5267 = vst [vmem:[%s7572_s12 + $0xc8] sm:$0xff] %v5940_v13  ;;  %v5941_v18 = vpack.c.bf16 %v2744_v16, %v2742_v14  ;;  %v5942_v19 = vpack.c.bf16 %v3450_v17, %v3448_v15 }
 0x2bd   : > { %5268 = vst [vmem:[%s7572_s12 + $0xd0] sm:$0xff] %v5941_v18  ;;  %5269 = vst [vmem:[%s7572_s12 + $0xd8] sm:$0xff] %v5942_v19 }
 0x2bf   : > { %v2748_v20 = vpop.f32.mrb[28].mxu0  ;;  %v3454_v21 = vpop.f32.mrb[28].mxu1 }
 0x2c0   : > { %v2750_v22 = vpop.f32.mrb[29].mxu0  ;;  %v3456_v23 = vpop.f32.mrb[29].mxu1 }
 0x2c1   : > { %v5943_v24 = vpack.c.bf16 %v2750_v22, %v2748_v20  ;;  %v5944_v25 = vpack.c.bf16 %v3456_v23, %v3454_v21  ;;  %v2752_v26 = vpop.f32.mrb[30].mxu0  ;;  %v3458_v27 = vpop.f32.mrb[30].mxu1 }
 0x2c2   : > { %v2754_v28 = vpop.f32.mrb[31].mxu0  ;;  %v3460_v29 = vpop.f32.mrb[31].mxu1 }
 0x2c3   : > { %5270 = vst [vmem:[%s7572_s12 + $0xe0] sm:$0xff] %v5943_v24  ;;  %5271 = vst [vmem:[%s7572_s12 + $0xe8] sm:$0xff] %v5944_v25  ;;  %v5945_v30 = vpack.c.bf16 %v2754_v28, %v2752_v26  ;;  %v5946_v31 = vpack.c.bf16 %v3460_v29, %v3458_v27 }
 0x2c5   : > { %5272 = vst [vmem:[%s7572_s12 + $0xf0] sm:$0xff] %v5945_v30  ;;  %5273 = vst [vmem:[%s7572_s12 + $0xf8] sm:$0xff] %v5946_v31 }
 0x2c7   : > { %v2758_v32 = vpop.f32.mrb[32].mxu0  ;;  %v3464_v33 = vpop.f32.mrb[32].mxu1 }
 0x2c8   : > { %v2760_v34 = vpop.f32.mrb[33].mxu0  ;;  %v3466_v35 = vpop.f32.mrb[33].mxu1 }
 0x2c9   : > { %v5947_v36 = vpack.c.bf16 %v2760_v34, %v2758_v32  ;;  %v5948_v37 = vpack.c.bf16 %v3466_v35, %v3464_v33  ;;  %v2762_v38 = vpop.f32.mrb[34].mxu0  ;;  %v3468_v39 = vpop.f32.mrb[34].mxu1 }
 0x2ca   : > { %v2764_v40 = vpop.f32.mrb[35].mxu0  ;;  %v3470_v41 = vpop.f32.mrb[35].mxu1 }
 0x2cb   : > { %5274 = vst [vmem:[%s7572_s12 + $0x100] sm:$0xff] %v5947_v36  ;;  %5275 = vst [vmem:[%s7572_s12 + $0x108] sm:$0xff] %v5948_v37  ;;  %v5949_v42 = vpack.c.bf16 %v2764_v40, %v2762_v38  ;;  %v5950_v43 = vpack.c.bf16 %v3470_v41, %v3468_v39 }
 0x2cd   : > { %5276 = vst [vmem:[%s7572_s12 + $0x110] sm:$0xff] %v5949_v42  ;;  %5277 = vst [vmem:[%s7572_s12 + $0x118] sm:$0xff] %v5950_v43 }
 0x2cf   : > { %v2768_v44 = vpop.f32.mrb[36].mxu0  ;;  %v3474_v45 = vpop.f32.mrb[36].mxu1 }
 0x2d0   : > { %v2770_v46 = vpop.f32.mrb[37].mxu0  ;;  %v3476_v47 = vpop.f32.mrb[37].mxu1 }
 0x2d1   : > { %v5951_v48 = vpack.c.bf16 %v2770_v46, %v2768_v44  ;;  %v5952_v49 = vpack.c.bf16 %v3476_v47, %v3474_v45  ;;  %v2772_v50 = vpop.f32.mrb[38].mxu0  ;;  %v3478_v51 = vpop.f32.mrb[38].mxu1 }
 0x2d2   : > { %v2774_v52 = vpop.f32.mrb[39].mxu0  ;;  %v3480_v53 = vpop.f32.mrb[39].mxu1 }
 0x2d3   : > { %5278 = vst [vmem:[%s7572_s12 + $0x120] sm:$0xff] %v5951_v48  ;;  %5279 = vst [vmem:[%s7572_s12 + $0x128] sm:$0xff] %v5952_v49  ;;  %v5953_v54 = vpack.c.bf16 %v2774_v52, %v2772_v50  ;;  %v5954_v55 = vpack.c.bf16 %v3480_v53, %v3478_v51 }
 0x2d5   : > { %5280 = vst [vmem:[%s7572_s12 + $0x130] sm:$0xff] %v5953_v54  ;;  %5281 = vst [vmem:[%s7572_s12 + $0x138] sm:$0xff] %v5954_v55 }
 0x2d7   : > { %v2778_v56 = vpop.f32.mrb[40].mxu0  ;;  %v3484_v57 = vpop.f32.mrb[40].mxu1 }
 0x2d8   : > { %v2780_v58 = vpop.f32.mrb[41].mxu0  ;;  %v3486_v59 = vpop.f32.mrb[41].mxu1 }
 0x2d9   : > { %v5955_v60 = vpack.c.bf16 %v2780_v58, %v2778_v56  ;;  %v5956_v61 = vpack.c.bf16 %v3486_v59, %v3484_v57  ;;  %v2782_v62 = vpop.f32.mrb[42].mxu0  ;;  %v3488_v63 = vpop.f32.mrb[42].mxu1 }
 0x2da   : > { %v2784_v0 = vpop.f32.mrb[43].mxu0  ;;  %v3490_v1 = vpop.f32.mrb[43].mxu1 }
 0x2db   : > { %5282 = vst [vmem:[%s7572_s12 + $0x140] sm:$0xff] %v5955_v60  ;;  %5283 = vst [vmem:[%s7572_s12 + $0x148] sm:$0xff] %v5956_v61  ;;  %v5957_v2 = vpack.c.bf16 %v2784_v0, %v2782_v62  ;;  %v5958_v3 = vpack.c.bf16 %v3490_v1, %v3488_v63 }
 0x2dd   : > { %5284 = vst [vmem:[%s7572_s12 + $0x150] sm:$0xff] %v5957_v2  ;;  %5285 = vst [vmem:[%s7572_s12 + $0x158] sm:$0xff] %v5958_v3 }
 0x2df   : > { %v2788_v4 = vpop.f32.mrb[44].mxu0  ;;  %v3494_v5 = vpop.f32.mrb[44].mxu1 }
 0x2e0   : > { %v2790_v6 = vpop.f32.mrb[45].mxu0  ;;  %v3496_v7 = vpop.f32.mrb[45].mxu1 }
 0x2e1   : > { %v5959_v8 = vpack.c.bf16 %v2790_v6, %v2788_v4  ;;  %v5960_v9 = vpack.c.bf16 %v3496_v7, %v3494_v5  ;;  %v2792_v10 = vpop.f32.mrb[46].mxu0  ;;  %v3498_v11 = vpop.f32.mrb[46].mxu1 }
 0x2e2   : > { %v2794_v12 = vpop.f32.mrb[47].mxu0  ;;  %v3500_v13 = vpop.f32.mrb[47].mxu1 }
 0x2e3   : > { %5286 = vst [vmem:[%s7572_s12 + $0x160] sm:$0xff] %v5959_v8  ;;  %5287 = vst [vmem:[%s7572_s12 + $0x168] sm:$0xff] %v5960_v9  ;;  %v5961_v14 = vpack.c.bf16 %v2794_v12, %v2792_v10  ;;  %v5962_v15 = vpack.c.bf16 %v3500_v13, %v3498_v11 }
 0x2e5   : > { %5288 = vst [vmem:[%s7572_s12 + $0x170] sm:$0xff] %v5961_v14  ;;  %5289 = vst [vmem:[%s7572_s12 + $0x178] sm:$0xff] %v5962_v15 }
 0x2e7   : > { %v2798_v16 = vpop.f32.mrb[48].mxu0  ;;  %v3504_v17 = vpop.f32.mrb[48].mxu1 }
 0x2e8   : > { %v2800_v18 = vpop.f32.mrb[49].mxu0  ;;  %v3506_v19 = vpop.f32.mrb[49].mxu1 }
 0x2e9   : > { %v5963_v20 = vpack.c.bf16 %v2800_v18, %v2798_v16  ;;  %v5964_v21 = vpack.c.bf16 %v3506_v19, %v3504_v17  ;;  %v2802_v22 = vpop.f32.mrb[50].mxu0  ;;  %v3508_v23 = vpop.f32.mrb[50].mxu1 }
 0x2ea   : > { %v2804_v24 = vpop.f32.mrb[51].mxu0  ;;  %v3510_v25 = vpop.f32.mrb[51].mxu1 }
 0x2eb   : > { %5290 = vst [vmem:[%s7572_s12 + $0x180] sm:$0xff] %v5963_v20  ;;  %5291 = vst [vmem:[%s7572_s12 + $0x188] sm:$0xff] %v5964_v21  ;;  %v5965_v26 = vpack.c.bf16 %v2804_v24, %v2802_v22  ;;  %v5966_v27 = vpack.c.bf16 %v3510_v25, %v3508_v23 }
 0x2ed   : > { %5292 = vst [vmem:[%s7572_s12 + $0x190] sm:$0xff] %v5965_v26  ;;  %5293 = vst [vmem:[%s7572_s12 + $0x198] sm:$0xff] %v5966_v27 }
 0x2ef   : > { %v2808_v28 = vpop.f32.mrb[52].mxu0  ;;  %v3514_v29 = vpop.f32.mrb[52].mxu1 }
 0x2f0   : > { %v2810_v30 = vpop.f32.mrb[53].mxu0  ;;  %v3516_v31 = vpop.f32.mrb[53].mxu1 }
 0x2f1   : > { %v5967_v32 = vpack.c.bf16 %v2810_v30, %v2808_v28  ;;  %v5968_v33 = vpack.c.bf16 %v3516_v31, %v3514_v29  ;;  %v2812_v34 = vpop.f32.mrb[54].mxu0  ;;  %v3518_v35 = vpop.f32.mrb[54].mxu1 }
 0x2f2   : > { %v2814_v36 = vpop.f32.mrb[55].mxu0  ;;  %v3520_v37 = vpop.f32.mrb[55].mxu1 }
 0x2f3   : > { %5294 = vst [vmem:[%s7572_s12 + $0x1a0] sm:$0xff] %v5967_v32  ;;  %5295 = vst [vmem:[%s7572_s12 + $0x1a8] sm:$0xff] %v5968_v33  ;;  %v5969_v38 = vpack.c.bf16 %v2814_v36, %v2812_v34  ;;  %v5970_v39 = vpack.c.bf16 %v3520_v37, %v3518_v35 }
 0x2f5   : > { %5296 = vst [vmem:[%s7572_s12 + $0x1b0] sm:$0xff] %v5969_v38  ;;  %5297 = vst [vmem:[%s7572_s12 + $0x1b8] sm:$0xff] %v5970_v39 }
 0x2f7   : > { %v2818_v40 = vpop.f32.mrb[56].mxu0  ;;  %v3524_v41 = vpop.f32.mrb[56].mxu1 }
 0x2f8   : > { %v2820_v42 = vpop.f32.mrb[57].mxu0  ;;  %v3526_v43 = vpop.f32.mrb[57].mxu1 }
 0x2f9   : > { %v5971_v44 = vpack.c.bf16 %v2820_v42, %v2818_v40  ;;  %v5972_v45 = vpack.c.bf16 %v3526_v43, %v3524_v41  ;;  %v2822_v46 = vpop.f32.mrb[58].mxu0  ;;  %v3528_v47 = vpop.f32.mrb[58].mxu1 }
 0x2fa   : > { %v2824_v48 = vpop.f32.mrb[59].mxu0  ;;  %v3530_v49 = vpop.f32.mrb[59].mxu1 }
 0x2fb   : > { %5298 = vst [vmem:[%s7572_s12 + $0x1c0] sm:$0xff] %v5971_v44  ;;  %5299 = vst [vmem:[%s7572_s12 + $0x1c8] sm:$0xff] %v5972_v45  ;;  %v5973_v50 = vpack.c.bf16 %v2824_v48, %v2822_v46  ;;  %v5974_v51 = vpack.c.bf16 %v3530_v49, %v3528_v47 }
 0x2fd   : > { %5300 = vst [vmem:[%s7572_s12 + $0x1d0] sm:$0xff] %v5973_v50  ;;  %5301 = vst [vmem:[%s7572_s12 + $0x1d8] sm:$0xff] %v5974_v51 }
 0x2ff   : > { %v2828_v52 = vpop.f32.mrb[60].mxu0  ;;  %v3534_v53 = vpop.f32.mrb[60].mxu1 }
 0x300   : > { %v2830_v54 = vpop.f32.mrb[61].mxu0  ;;  %v3536_v55 = vpop.f32.mrb[61].mxu1 }
 0x301   : > { %v5975_v56 = vpack.c.bf16 %v2830_v54, %v2828_v52  ;;  %v5976_v57 = vpack.c.bf16 %v3536_v55, %v3534_v53  ;;  %v2832_v58 = vpop.f32.mrb[62].mxu0  ;;  %v3538_v59 = vpop.f32.mrb[62].mxu1 }
 0x302   : > { %v2834_v60 = vpop.f32.mrb[63].mxu0  ;;  %v3540_v61 = vpop.f32.mrb[63].mxu1 }
 0x303   : > { %5302 = vst [vmem:[%s7572_s12 + $0x1e0] sm:$0xff] %v5975_v56  ;;  %5303 = vst [vmem:[%s7572_s12 + $0x1e8] sm:$0xff] %v5976_v57  ;;  %v5977_v62 = vpack.c.bf16 %v2834_v60, %v2832_v58  ;;  %v5978_v63 = vpack.c.bf16 %v3540_v61, %v3538_v59 }
 0x305   : > { %5304 = vst [vmem:[%s7572_s12 + $0x1f0] sm:$0xff] %v5977_v62  ;;  %5305 = vst [vmem:[%s7572_s12 + $0x1f8] sm:$0xff] %v5978_v63 }
 0x307   : > { %v2838_v0 = vpop.f32.mrb[64].mxu0  ;;  %v3544_v1 = vpop.f32.mrb[64].mxu1 }
 0x308   : > { %v2840_v2 = vpop.f32.mrb[65].mxu0  ;;  %v3546_v3 = vpop.f32.mrb[65].mxu1 }
 0x309   : > { %v5979_v4 = vpack.c.bf16 %v2840_v2, %v2838_v0  ;;  %v5980_v5 = vpack.c.bf16 %v3546_v3, %v3544_v1  ;;  %v2842_v6 = vpop.f32.mrb[66].mxu0  ;;  %v3548_v7 = vpop.f32.mrb[66].mxu1 }
 0x30a   : > { %v2844_v8 = vpop.f32.mrb[67].mxu0  ;;  %v3550_v9 = vpop.f32.mrb[67].mxu1 }
 0x30b   : > { %5306 = vst [vmem:[%s7572_s12 + $0x200] sm:$0xff] %v5979_v4  ;;  %5307 = vst [vmem:[%s7572_s12 + $0x208] sm:$0xff] %v5980_v5  ;;  %v5981_v10 = vpack.c.bf16 %v2844_v8, %v2842_v6  ;;  %v5982_v11 = vpack.c.bf16 %v3550_v9, %v3548_v7 }
 0x30d   : > { %5308 = vst [vmem:[%s7572_s12 + $0x210] sm:$0xff] %v5981_v10  ;;  %5309 = vst [vmem:[%s7572_s12 + $0x218] sm:$0xff] %v5982_v11 }
 0x30f   : > { %v2848_v12 = vpop.f32.mrb[68].mxu0  ;;  %v3554_v13 = vpop.f32.mrb[68].mxu1 }
 0x310   : > { %v2850_v14 = vpop.f32.mrb[69].mxu0  ;;  %v3556_v15 = vpop.f32.mrb[69].mxu1 }
 0x311   : > { %v5983_v16 = vpack.c.bf16 %v2850_v14, %v2848_v12  ;;  %v5984_v17 = vpack.c.bf16 %v3556_v15, %v3554_v13  ;;  %v2852_v18 = vpop.f32.mrb[70].mxu0  ;;  %v3558_v19 = vpop.f32.mrb[70].mxu1 }
 0x312   : > { %v2854_v20 = vpop.f32.mrb[71].mxu0  ;;  %v3560_v21 = vpop.f32.mrb[71].mxu1 }
 0x313   : > { %5310 = vst [vmem:[%s7572_s12 + $0x220] sm:$0xff] %v5983_v16  ;;  %5311 = vst [vmem:[%s7572_s12 + $0x228] sm:$0xff] %v5984_v17  ;;  %v5985_v22 = vpack.c.bf16 %v2854_v20, %v2852_v18  ;;  %v5986_v23 = vpack.c.bf16 %v3560_v21, %v3558_v19 }
 0x315   : > { %5312 = vst [vmem:[%s7572_s12 + $0x230] sm:$0xff] %v5985_v22  ;;  %5313 = vst [vmem:[%s7572_s12 + $0x238] sm:$0xff] %v5986_v23 }
 0x317   : > { %v2858_v24 = vpop.f32.mrb[72].mxu0  ;;  %v3564_v25 = vpop.f32.mrb[72].mxu1 }
 0x318   : > { %v2860_v26 = vpop.f32.mrb[73].mxu0  ;;  %v3566_v27 = vpop.f32.mrb[73].mxu1 }
 0x319   : > { %v5987_v28 = vpack.c.bf16 %v2860_v26, %v2858_v24  ;;  %v5988_v29 = vpack.c.bf16 %v3566_v27, %v3564_v25  ;;  %v2862_v30 = vpop.f32.mrb[74].mxu0  ;;  %v3568_v31 = vpop.f32.mrb[74].mxu1 }
 0x31a   : > { %v2864_v32 = vpop.f32.mrb[75].mxu0  ;;  %v3570_v33 = vpop.f32.mrb[75].mxu1 }
 0x31b   : > { %5314 = vst [vmem:[%s7572_s12 + $0x240] sm:$0xff] %v5987_v28  ;;  %5315 = vst [vmem:[%s7572_s12 + $0x248] sm:$0xff] %v5988_v29  ;;  %v5989_v34 = vpack.c.bf16 %v2864_v32, %v2862_v30  ;;  %v5990_v35 = vpack.c.bf16 %v3570_v33, %v3568_v31 }
 0x31d   : > { %5316 = vst [vmem:[%s7572_s12 + $0x250] sm:$0xff] %v5989_v34  ;;  %5317 = vst [vmem:[%s7572_s12 + $0x258] sm:$0xff] %v5990_v35 }
 0x31f   : > { %v2868_v36 = vpop.f32.mrb[76].mxu0  ;;  %v3574_v37 = vpop.f32.mrb[76].mxu1 }
 0x320   : > { %v2870_v38 = vpop.f32.mrb[77].mxu0  ;;  %v3576_v39 = vpop.f32.mrb[77].mxu1 }
 0x321   : > { %v5991_v40 = vpack.c.bf16 %v2870_v38, %v2868_v36  ;;  %v5992_v41 = vpack.c.bf16 %v3576_v39, %v3574_v37  ;;  %v2872_v42 = vpop.f32.mrb[78].mxu0  ;;  %v3578_v43 = vpop.f32.mrb[78].mxu1 }
 0x322   : > { %v2874_v44 = vpop.f32.mrb[79].mxu0  ;;  %v3580_v45 = vpop.f32.mrb[79].mxu1 }
 0x323   : > { %5318 = vst [vmem:[%s7572_s12 + $0x260] sm:$0xff] %v5991_v40  ;;  %5319 = vst [vmem:[%s7572_s12 + $0x268] sm:$0xff] %v5992_v41  ;;  %v5993_v46 = vpack.c.bf16 %v2874_v44, %v2872_v42  ;;  %v5994_v47 = vpack.c.bf16 %v3580_v45, %v3578_v43 }
 0x325   : > { %5320 = vst [vmem:[%s7572_s12 + $0x270] sm:$0xff] %v5993_v46  ;;  %5321 = vst [vmem:[%s7572_s12 + $0x278] sm:$0xff] %v5994_v47 }
 0x327   : > { %v2878_v48 = vpop.f32.mrb[80].mxu0  ;;  %v3584_v49 = vpop.f32.mrb[80].mxu1 }
 0x328   : > { %v2880_v50 = vpop.f32.mrb[81].mxu0  ;;  %v3586_v51 = vpop.f32.mrb[81].mxu1 }
 0x329   : > { %v5995_v52 = vpack.c.bf16 %v2880_v50, %v2878_v48  ;;  %v5996_v53 = vpack.c.bf16 %v3586_v51, %v3584_v49  ;;  %v2882_v54 = vpop.f32.mrb[82].mxu0  ;;  %v3588_v55 = vpop.f32.mrb[82].mxu1 }
 0x32a   : > { %v2884_v56 = vpop.f32.mrb[83].mxu0  ;;  %v3590_v57 = vpop.f32.mrb[83].mxu1 }
 0x32b   : > { %5322 = vst [vmem:[%s7572_s12 + $0x280] sm:$0xff] %v5995_v52  ;;  %5323 = vst [vmem:[%s7572_s12 + $0x288] sm:$0xff] %v5996_v53  ;;  %v5997_v58 = vpack.c.bf16 %v2884_v56, %v2882_v54  ;;  %v5998_v59 = vpack.c.bf16 %v3590_v57, %v3588_v55 }
 0x32d   : > { %5324 = vst [vmem:[%s7572_s12 + $0x290] sm:$0xff] %v5997_v58  ;;  %5325 = vst [vmem:[%s7572_s12 + $0x298] sm:$0xff] %v5998_v59 }
 0x32f   : > { %v2888_v60 = vpop.f32.mrb[84].mxu0  ;;  %v3594_v61 = vpop.f32.mrb[84].mxu1 }
 0x330   : > { %v2890_v62 = vpop.f32.mrb[85].mxu0  ;;  %v3596_v63 = vpop.f32.mrb[85].mxu1 }
 0x331   : > { %v5999_v0 = vpack.c.bf16 %v2890_v62, %v2888_v60  ;;  %v6000_v1 = vpack.c.bf16 %v3596_v63, %v3594_v61  ;;  %v2892_v2 = vpop.f32.mrb[86].mxu0  ;;  %v3598_v3 = vpop.f32.mrb[86].mxu1 }
 0x332   : > { %v2894_v4 = vpop.f32.mrb[87].mxu0  ;;  %v3600_v5 = vpop.f32.mrb[87].mxu1 }
 0x333   : > { %5326 = vst [vmem:[%s7572_s12 + $0x2a0] sm:$0xff] %v5999_v0  ;;  %5327 = vst [vmem:[%s7572_s12 + $0x2a8] sm:$0xff] %v6000_v1  ;;  %v6001_v6 = vpack.c.bf16 %v2894_v4, %v2892_v2  ;;  %v6002_v7 = vpack.c.bf16 %v3600_v5, %v3598_v3 }
 0x335   : > { %5328 = vst [vmem:[%s7572_s12 + $0x2b0] sm:$0xff] %v6001_v6  ;;  %5329 = vst [vmem:[%s7572_s12 + $0x2b8] sm:$0xff] %v6002_v7 }
 0x337   : > { %v2898_v8 = vpop.f32.mrb[88].mxu0  ;;  %v3604_v9 = vpop.f32.mrb[88].mxu1 }
 0x338   : > { %v2900_v10 = vpop.f32.mrb[89].mxu0  ;;  %v3606_v11 = vpop.f32.mrb[89].mxu1 }
 0x339   : > { %v6003_v12 = vpack.c.bf16 %v2900_v10, %v2898_v8  ;;  %v6004_v13 = vpack.c.bf16 %v3606_v11, %v3604_v9  ;;  %v2902_v14 = vpop.f32.mrb[90].mxu0  ;;  %v3608_v15 = vpop.f32.mrb[90].mxu1 }
 0x33a   : > { %v2904_v16 = vpop.f32.mrb[91].mxu0  ;;  %v3610_v17 = vpop.f32.mrb[91].mxu1 }
 0x33b   : > { %5330 = vst [vmem:[%s7572_s12 + $0x2c0] sm:$0xff] %v6003_v12  ;;  %5331 = vst [vmem:[%s7572_s12 + $0x2c8] sm:$0xff] %v6004_v13  ;;  %v6005_v18 = vpack.c.bf16 %v2904_v16, %v2902_v14  ;;  %v6006_v19 = vpack.c.bf16 %v3610_v17, %v3608_v15 }
 0x33d   : > { %5332 = vst [vmem:[%s7572_s12 + $0x2d0] sm:$0xff] %v6005_v18  ;;  %5333 = vst [vmem:[%s7572_s12 + $0x2d8] sm:$0xff] %v6006_v19 }
 0x33f   : > { %v2908_v20 = vpop.f32.mrb[92].mxu0  ;;  %v3614_v21 = vpop.f32.mrb[92].mxu1 }
 0x340   : > { %v2910_v22 = vpop.f32.mrb[93].mxu0  ;;  %v3616_v23 = vpop.f32.mrb[93].mxu1 }
 0x341   : > { %v6007_v24 = vpack.c.bf16 %v2910_v22, %v2908_v20  ;;  %v6008_v25 = vpack.c.bf16 %v3616_v23, %v3614_v21  ;;  %v2912_v26 = vpop.f32.mrb[94].mxu0  ;;  %v3618_v27 = vpop.f32.mrb[94].mxu1 }
 0x342   : > { %v2914_v28 = vpop.f32.mrb[95].mxu0  ;;  %v3620_v29 = vpop.f32.mrb[95].mxu1 }
 0x343   : > { %5334 = vst [vmem:[%s7572_s12 + $0x2e0] sm:$0xff] %v6007_v24  ;;  %5335 = vst [vmem:[%s7572_s12 + $0x2e8] sm:$0xff] %v6008_v25  ;;  %v6009_v30 = vpack.c.bf16 %v2914_v28, %v2912_v26  ;;  %v6010_v31 = vpack.c.bf16 %v3620_v29, %v3618_v27 }
 0x345   : > { %5336 = vst [vmem:[%s7572_s12 + $0x2f0] sm:$0xff] %v6009_v30  ;;  %5337 = vst [vmem:[%s7572_s12 + $0x2f8] sm:$0xff] %v6010_v31 }
 0x347   : > { %v2918_v32 = vpop.f32.mrb[96].mxu0  ;;  %v3624_v33 = vpop.f32.mrb[96].mxu1 }
 0x348   : > { %v2920_v34 = vpop.f32.mrb[97].mxu0  ;;  %v3626_v35 = vpop.f32.mrb[97].mxu1 }
 0x349   : > { %v6011_v36 = vpack.c.bf16 %v2920_v34, %v2918_v32  ;;  %v6012_v37 = vpack.c.bf16 %v3626_v35, %v3624_v33  ;;  %v2922_v38 = vpop.f32.mrb[98].mxu0  ;;  %v3628_v39 = vpop.f32.mrb[98].mxu1 }
 0x34a   : > { %v2924_v40 = vpop.f32.mrb[99].mxu0  ;;  %v3630_v41 = vpop.f32.mrb[99].mxu1 }
 0x34b   : > { %5338 = vst [vmem:[%s7572_s12 + $0x300] sm:$0xff] %v6011_v36  ;;  %5339 = vst [vmem:[%s7572_s12 + $0x308] sm:$0xff] %v6012_v37  ;;  %v6013_v42 = vpack.c.bf16 %v2924_v40, %v2922_v38  ;;  %v6014_v43 = vpack.c.bf16 %v3630_v41, %v3628_v39 }
 0x34d   : > { %5340 = vst [vmem:[%s7572_s12 + $0x310] sm:$0xff] %v6013_v42  ;;  %5341 = vst [vmem:[%s7572_s12 + $0x318] sm:$0xff] %v6014_v43 }
 0x34f   : > { %v2928_v44 = vpop.f32.mrb[100].mxu0  ;;  %v3634_v45 = vpop.f32.mrb[100].mxu1 }
 0x350   : > { %v2930_v46 = vpop.f32.mrb[101].mxu0  ;;  %v3636_v47 = vpop.f32.mrb[101].mxu1 }
 0x351   : > { %v6015_v48 = vpack.c.bf16 %v2930_v46, %v2928_v44  ;;  %v6016_v49 = vpack.c.bf16 %v3636_v47, %v3634_v45  ;;  %v2932_v50 = vpop.f32.mrb[102].mxu0  ;;  %v3638_v51 = vpop.f32.mrb[102].mxu1 }
 0x352   : > { %v2934_v52 = vpop.f32.mrb[103].mxu0  ;;  %v3640_v53 = vpop.f32.mrb[103].mxu1 }
 0x353   : > { %5342 = vst [vmem:[%s7572_s12 + $0x320] sm:$0xff] %v6015_v48  ;;  %5343 = vst [vmem:[%s7572_s12 + $0x328] sm:$0xff] %v6016_v49  ;;  %v6017_v54 = vpack.c.bf16 %v2934_v52, %v2932_v50  ;;  %v6018_v55 = vpack.c.bf16 %v3640_v53, %v3638_v51 }
 0x355   : > { %5344 = vst [vmem:[%s7572_s12 + $0x330] sm:$0xff] %v6017_v54  ;;  %5345 = vst [vmem:[%s7572_s12 + $0x338] sm:$0xff] %v6018_v55 }
 0x357   : > { %v2938_v56 = vpop.f32.mrb[104].mxu0  ;;  %v3644_v57 = vpop.f32.mrb[104].mxu1 }
 0x358   : > { %v2940_v58 = vpop.f32.mrb[105].mxu0  ;;  %v3646_v59 = vpop.f32.mrb[105].mxu1 }
 0x359   : > { %v6019_v60 = vpack.c.bf16 %v2940_v58, %v2938_v56  ;;  %v6020_v61 = vpack.c.bf16 %v3646_v59, %v3644_v57  ;;  %v2942_v62 = vpop.f32.mrb[106].mxu0  ;;  %v3648_v63 = vpop.f32.mrb[106].mxu1 }
 0x35a   : > { %v2944_v0 = vpop.f32.mrb[107].mxu0  ;;  %v3650_v1 = vpop.f32.mrb[107].mxu1 }
 0x35b   : > { %5346 = vst [vmem:[%s7572_s12 + $0x340] sm:$0xff] %v6019_v60  ;;  %5347 = vst [vmem:[%s7572_s12 + $0x348] sm:$0xff] %v6020_v61  ;;  %v6021_v2 = vpack.c.bf16 %v2944_v0, %v2942_v62  ;;  %v6022_v3 = vpack.c.bf16 %v3650_v1, %v3648_v63 }
 0x35d   : > { %5348 = vst [vmem:[%s7572_s12 + $0x350] sm:$0xff] %v6021_v2  ;;  %5349 = vst [vmem:[%s7572_s12 + $0x358] sm:$0xff] %v6022_v3 }
 0x35f   : > { %v2948_v4 = vpop.f32.mrb[108].mxu0  ;;  %v3654_v5 = vpop.f32.mrb[108].mxu1 }
 0x360   : > { %v2950_v6 = vpop.f32.mrb[109].mxu0  ;;  %v3656_v7 = vpop.f32.mrb[109].mxu1 }
 0x361   : > { %v6023_v8 = vpack.c.bf16 %v2950_v6, %v2948_v4  ;;  %v6024_v9 = vpack.c.bf16 %v3656_v7, %v3654_v5  ;;  %v2952_v10 = vpop.f32.mrb[110].mxu0  ;;  %v3658_v11 = vpop.f32.mrb[110].mxu1 }
 0x362   : > { %v2954_v12 = vpop.f32.mrb[111].mxu0  ;;  %v3660_v13 = vpop.f32.mrb[111].mxu1 }
 0x363   : > { %5350 = vst [vmem:[%s7572_s12 + $0x360] sm:$0xff] %v6023_v8  ;;  %5351 = vst [vmem:[%s7572_s12 + $0x368] sm:$0xff] %v6024_v9  ;;  %v6025_v14 = vpack.c.bf16 %v2954_v12, %v2952_v10  ;;  %v6026_v15 = vpack.c.bf16 %v3660_v13, %v3658_v11 }
 0x365   : > { %5352 = vst [vmem:[%s7572_s12 + $0x370] sm:$0xff] %v6025_v14  ;;  %5353 = vst [vmem:[%s7572_s12 + $0x378] sm:$0xff] %v6026_v15 }
 0x367   : > { %v2958_v16 = vpop.f32.mrb[112].mxu0  ;;  %v3664_v17 = vpop.f32.mrb[112].mxu1 }
 0x368   : > { %v2960_v18 = vpop.f32.mrb[113].mxu0  ;;  %v3666_v19 = vpop.f32.mrb[113].mxu1 }
 0x369   : > { %v6027_v20 = vpack.c.bf16 %v2960_v18, %v2958_v16  ;;  %v6028_v21 = vpack.c.bf16 %v3666_v19, %v3664_v17  ;;  %v2962_v22 = vpop.f32.mrb[114].mxu0  ;;  %v3668_v23 = vpop.f32.mrb[114].mxu1 }
 0x36a   : > { %v2964_v24 = vpop.f32.mrb[115].mxu0  ;;  %v3670_v25 = vpop.f32.mrb[115].mxu1 }
 0x36b   : > { %5354 = vst [vmem:[%s7572_s12 + $0x380] sm:$0xff] %v6027_v20  ;;  %5355 = vst [vmem:[%s7572_s12 + $0x388] sm:$0xff] %v6028_v21  ;;  %v6029_v26 = vpack.c.bf16 %v2964_v24, %v2962_v22  ;;  %v6030_v27 = vpack.c.bf16 %v3670_v25, %v3668_v23 }
 0x36d   : > { %5356 = vst [vmem:[%s7572_s12 + $0x390] sm:$0xff] %v6029_v26  ;;  %5357 = vst [vmem:[%s7572_s12 + $0x398] sm:$0xff] %v6030_v27 }
 0x36f   : > { %v2968_v28 = vpop.f32.mrb[116].mxu0  ;;  %v3674_v29 = vpop.f32.mrb[116].mxu1 }
 0x370   : > { %v2970_v30 = vpop.f32.mrb[117].mxu0  ;;  %v3676_v31 = vpop.f32.mrb[117].mxu1 }
 0x371   : > { %v6031_v32 = vpack.c.bf16 %v2970_v30, %v2968_v28  ;;  %v6032_v33 = vpack.c.bf16 %v3676_v31, %v3674_v29  ;;  %v2972_v34 = vpop.f32.mrb[118].mxu0  ;;  %v3678_v35 = vpop.f32.mrb[118].mxu1 }
 0x372   : > { %v2974_v36 = vpop.f32.mrb[119].mxu0  ;;  %v3680_v37 = vpop.f32.mrb[119].mxu1 }
 0x373   : > { %5358 = vst [vmem:[%s7572_s12 + $0x3a0] sm:$0xff] %v6031_v32  ;;  %5359 = vst [vmem:[%s7572_s12 + $0x3a8] sm:$0xff] %v6032_v33  ;;  %v6033_v38 = vpack.c.bf16 %v2974_v36, %v2972_v34  ;;  %v6034_v39 = vpack.c.bf16 %v3680_v37, %v3678_v35 }
 0x375   : > { %5360 = vst [vmem:[%s7572_s12 + $0x3b0] sm:$0xff] %v6033_v38  ;;  %5361 = vst [vmem:[%s7572_s12 + $0x3b8] sm:$0xff] %v6034_v39 }
 0x377   : > { %v2978_v40 = vpop.f32.mrb[120].mxu0  ;;  %v3684_v41 = vpop.f32.mrb[120].mxu1 }
 0x378   : > { %v2980_v42 = vpop.f32.mrb[121].mxu0  ;;  %v3686_v43 = vpop.f32.mrb[121].mxu1 }
 0x379   : > { %v6035_v44 = vpack.c.bf16 %v2980_v42, %v2978_v40  ;;  %v6036_v45 = vpack.c.bf16 %v3686_v43, %v3684_v41  ;;  %v2982_v46 = vpop.f32.mrb[122].mxu0  ;;  %v3688_v47 = vpop.f32.mrb[122].mxu1 }
 0x37a   : > { %v2984_v48 = vpop.f32.mrb[123].mxu0  ;;  %v3690_v49 = vpop.f32.mrb[123].mxu1 }
 0x37b   : > { %5362 = vst [vmem:[%s7572_s12 + $0x3c0] sm:$0xff] %v6035_v44  ;;  %5363 = vst [vmem:[%s7572_s12 + $0x3c8] sm:$0xff] %v6036_v45  ;;  %v6037_v50 = vpack.c.bf16 %v2984_v48, %v2982_v46  ;;  %v6038_v51 = vpack.c.bf16 %v3690_v49, %v3688_v47 }
 0x37d   : > { %5364 = vst [vmem:[%s7572_s12 + $0x3d0] sm:$0xff] %v6037_v50  ;;  %5365 = vst [vmem:[%s7572_s12 + $0x3d8] sm:$0xff] %v6038_v51 }
 0x37f   : > { %v2988_v52 = vpop.f32.mrb[124].mxu0  ;;  %v3694_v53 = vpop.f32.mrb[124].mxu1 }
 0x380   : > { %v2990_v54 = vpop.f32.mrb[125].mxu0  ;;  %v3696_v55 = vpop.f32.mrb[125].mxu1 }
 0x381   : > { %v6039_v56 = vpack.c.bf16 %v2990_v54, %v2988_v52  ;;  %v6040_v57 = vpack.c.bf16 %v3696_v55, %v3694_v53  ;;  %v2992_v58 = vpop.f32.mrb[126].mxu0  ;;  %v3698_v59 = vpop.f32.mrb[126].mxu1 }
 0x382   : > { %v2994_v60 = vpop.f32.mrb[127].mxu0  ;;  %v3700_v61 = vpop.f32.mrb[127].mxu1 }
 0x383   : > { %5366 = vst [vmem:[%s7572_s12 + $0x3e0] sm:$0xff] %v6039_v56  ;;  %5367 = vst [vmem:[%s7572_s12 + $0x3e8] sm:$0xff] %v6040_v57  ;;  %v6041_v62 = vpack.c.bf16 %v2994_v60, %v2992_v58  ;;  %v6042_v63 = vpack.c.bf16 %v3700_v61, %v3698_v59 }
 0x385   : > { %5368 = vst [vmem:[%s7572_s12 + $0x3f0] sm:$0xff] %v6041_v62  ;;  %5369 = vst [vmem:[%s7572_s12 + $0x3f8] sm:$0xff] %v6042_v63 }
 0x386   : > { %6894 = shalt.err (!%p6891_p11)
}
 0x387   : > { %s6895_s28 = scalar_lea.hbm %s7711_s23, 16384  ;;  %s6899_s26 = scalar_lea.hbm %s7842_s8, 98304 }
 0x388   : > { %p6896_p2 = scmp.ne.s32.totalorder %s7711_s23, %s6895_s28  ;;  %p6900_p7 = scmp.lt.u32.totalorder %s7711_s23, %s7842_s8 }
 0x389   : > { %p6901_p13 = scmp.lt.u32.totalorder %s6899_s26, %s6895_s28  ;;  %p6903_p1 = scmp.lt.u32.totalorder %s6895_s28, %s7711_s23 }
 0x38a   : > { %p6897_p5 = pnand %p6896_p2, %p7843_p12 }
 0x38b   : > { %p6902_p6 = por %p6901_p13, %p6900_p7 }
 0x38c   : > { %p6898_p3 = pneg %p6897_p5 }
 0x38d   : > { %p6904_p9 = por %p6903_p1, %p6902_p6 }
 0x38f   : > { %p6905_p0 = pnand %p6904_p9, %p6898_p3 }
 0x391   : > { %6908 = shalt.err (!%p6905_p0)
}
 0x392   : > { %s7039_s19 = smov 256   ;;  %s7040_s4 = smov 768  }
 0x393   : > { %s7041_s15 = smov 16  }
 0x394   : > { %6304 = dma.vmem_to_hbm [thread:$0]  (%p7843_p12), %s7713_s18, 16384, %s7711_s23, %s7721_s5, %s7039_s19, %s7040_s4, %s7041_s15  }
 0x395 PF: > { %p6318_p4 = scmp.ge.s32.totalorder %s7031_s22, 2  ;;  %s5402_s25 = sand.u32 1, %s6979_s9  }
 0x396   : > { %p7844_p10 = scmp.ne.s32.totalorder %s7833_s27, 0  ;;  %s5403_s2 = scalar_lea.sflag [#allocation5], %s5402_s25 }
 0x398   : > { %p6314_p8 = pnand %p6318_p4, %p7844_p10 }
 0x39a   : > { %6974 = dma.done.wait (!%p6314_p8), %s5403_s2, 16384  }
 0x39b   : > { %6976 = vsyncadd (!%p6314_p8), %s5403_s2, 4294950912  ;;  %s21_s22 = sadd.s32 1, %s7031_s22   ;;  %s7846_s18 = sld [smem:[#allocation16_spill]] }
 0x39c   : > { %p7750_p11 = scmp.ge.s32.totalorder %s21_s22, 8   ;;  %s7847_s19 = sld [smem:[#allocation13_spill]] }
 0x39d   : > { %s7848_s27 = sld [smem:[#allocation14_spill]]  ;;  %s7849_s21 = sld [smem:[#allocation15_spill]] }
 0x39e   : > { %s7850_s9 = smov %s6983_s10  ;;  %s7851_s10 = smov %s6987_s11 }
 0x39f   : > { %s7852_s11 = smov %s7251_s30  ;;  %s7853_s12 = smov %s6995_s13 }
 0x3a0   : > { %s7854_s13 = smov %s6999_s14  ;;  %s7856_s15 = smov %s7007_s16 }
 0x3a1   : > { %s7855_s14 = smov %s7846_s18  ;;  %s7857_s16 = smov %s7011_s17 }
 0x3a2   : > { %s7858_s17 = smov %s7248_s0  ;;  %s7859_s18 = smov %s7023_s20 }
 0x3a3   : > { %s7860_s20 = smov %s7848_s27  ;;  %20 = sbr.rel (!%p7750_p11) target bundleno = 15 (0xf), region = 94 }
 0x3aa   :  { %5408 = vsyncpa [#allocation4], 1 }
 0x3ab   :  { %5410 = vsyncpa [#allocation4 + $0x1], 1 }
 0x3ac   :  { %5411 = vsyncpa [#allocation7], 1 }
 0x3ad   :  { %5413 = vsyncpa [#allocation7 + $0x1], 1 }
 0x3ae   :  { %5414 = vsyncpa [#allocation5], 1 }
 0x3af   :  { %5416 = vsyncpa [#allocation5 + $0x1], 1 }

</bundles_post_ra>
